<compile_context>
chip_gen: v6e
topology: v6e:2x2x1
jax: 0.10.0
libtpu: 0.0.40
codegen_flags: <defaults>
</compile_context>

<pallas_src>
import functools

import jax
import jax.numpy as jnp
from jax.experimental import pallas as pl
from jax.experimental.pallas import tpu as pltpu

_BN_EPS = 1e-5


def _round_up(n, m):
    return ((n + m - 1) // m) * m


def _bn_train(h, gamma, beta):
    """BatchNorm1d, training mode: normalize over batch axis, biased batch variance."""
    mean = jnp.mean(h, axis=0, keepdims=True)
    ctr = h - mean
    var = jnp.mean(ctr * ctr, axis=0, keepdims=True)
    return gamma * ctr * jax.lax.rsqrt(var + _BN_EPS) + beta


def vae_forward_kernel(
    x_ref, eps_ref,
    w_enc_ref, w_heads_ref, w_dec_ref, w_out_ref,
    bn_h_ref, bn_heads_ref, bias_out_ref,
    heads_ref, recon_ref,
):
    ep = eps_ref.shape[-1]                      # padded latent width (128)

    bn_h = bn_h_ref[...]                        # (4, Hp): g_enc, b_enc, g_dec, b_dec
    bn_heads = bn_heads_ref[...]                # (2, 2*Ep): gamma, beta

    # ---- encoder: Linear(D -> H, bias=False) [bf16 MXU] -> ReLU -> BatchNorm1d ----
    h = jnp.dot(x_ref[...], w_enc_ref[...], preferred_element_type=jnp.float32)
    h = jnp.maximum(h, 0.0)
    h = _bn_train(h, bn_h[0:1, :], bn_h[1:2, :])          # (N, Hp) f32

    # ---- fused mu/logvar heads: one Linear(H -> 2E) + BatchNorm1d ----
    # (fc biases dropped: exactly cancelled by the batch-mean subtraction below)
    heads = jnp.dot(h, w_heads_ref[...], preferred_element_type=jnp.float32)
    heads = _bn_train(heads, bn_heads[0:1, :], bn_heads[1:2, :])   # (N, 2*Ep)
    heads_ref[...] = heads

    mu = heads[:, :ep]                                     # (N, Ep)
    logvar = heads[:, ep:]                                 # (N, Ep)

    # ---- reparameterize: z = mu + eps * exp(0.5 * logvar) ----
    z = mu + eps_ref[...] * jnp.exp(0.5 * logvar)          # (N, Ep)

    # ---- decoder: Linear(E -> H, bias=False) -> ReLU -> BatchNorm1d ----
    d = jnp.dot(z, w_dec_ref[...], preferred_element_type=jnp.float32)
    d = jnp.maximum(d, 0.0)
    d = _bn_train(d, bn_h[2:3, :], bn_h[3:4, :])           # (N, Hp)

    # ---- output head: Linear(H -> D) [bf16 MXU] -> sigmoid ----
    o = jnp.dot(d.astype(w_out_ref.dtype), w_out_ref[...],
                preferred_element_type=jnp.float32) + bias_out_ref[...]
    recon_ref[...] = jax.nn.sigmoid(o)                     # (N, Dp)


def init_vae_params(key, size_in, size_emb=5, hidden=400, channels=3):
    """Deterministic synthetic parameters, stored PyTorch-style but pre-transposed
    as (in_features, out_features) so the kernel computes x @ W."""
    d = size_in * size_in * channels
    keys = jax.random.split(key, 6)

    def lin(k, fan_in, fan_out):
        bound = 1.0 / jnp.sqrt(jnp.float32(fan_in))
        return jax.random.uniform(k, (fan_in, fan_out), jnp.float32, -bound, bound)

    return dict(
        w_enc=lin(keys[0], d, hidden),
        g_enc=jnp.ones((1, hidden), jnp.float32),
        b_enc=jnp.zeros((1, hidden), jnp.float32),
        # fc_mu / fc_std biases omitted: a constant per-feature bias is exactly
        # removed by the training-mode BatchNorm that follows them.
        w_mu=lin(keys[1], hidden, size_emb),
        g_mu=jnp.ones((1, size_emb), jnp.float32),
        b_mu=jnp.zeros((1, size_emb), jnp.float32),
        w_std=lin(keys[2], hidden, size_emb),
        g_std=jnp.ones((1, size_emb), jnp.float32),
        b_std=jnp.zeros((1, size_emb), jnp.float32),
        w_dec=lin(keys[3], size_emb, hidden),
        g_dec=jnp.ones((1, hidden), jnp.float32),
        b_dec=jnp.zeros((1, hidden), jnp.float32),
        w_out=lin(keys[4], hidden, d),
        bias_out=jax.random.uniform(keys[5], (1, d), jnp.float32, -0.05, 0.05),
    )


def pack_vae_params(p, *, size_emb, hidden, d_in):
    """Pad widths to multiples of 128, fuse the mu/std heads, pack the tiny
    per-feature vectors, and cast the two big weights to bf16."""
    hp = _round_up(hidden, 128)       # 400 -> 512
    ep = _round_up(size_emb, 128)     # 5   -> 128
    dp = _round_up(d_in, 128)

    def pad2(a, rows, cols, val=0.0):
        return jnp.pad(a, ((0, rows - a.shape[0]), (0, cols - a.shape[1])),
                       constant_values=val)

    w_enc = pad2(p["w_enc"], dp, hp).astype(jnp.bfloat16)
    w_out = pad2(p["w_out"], hp, dp).astype(jnp.bfloat16)
    w_dec = pad2(p["w_dec"], ep, hp)
    w_heads = jnp.concatenate(
        [pad2(p["w_mu"], hp, ep), pad2(p["w_std"], hp, ep)], axis=1)

    bn_h = jnp.concatenate([
        pad2(p["g_enc"], 1, hp, 1.0), pad2(p["b_enc"], 1, hp),
        pad2(p["g_dec"], 1, hp, 1.0), pad2(p["b_dec"], 1, hp)], axis=0)
    bn_heads = jnp.concatenate([
        jnp.concatenate([pad2(p["g_mu"], 1, ep, 1.0),
                         pad2(p["g_std"], 1, ep, 1.0)], axis=1),
        jnp.concatenate([pad2(p["b_mu"], 1, ep),
                         pad2(p["b_std"], 1, ep)], axis=1)], axis=0)
    bias_out = pad2(p["bias_out"], 1, dp)

    return dict(w_enc=w_enc, w_heads=w_heads, w_dec=w_dec, w_out=w_out,
                bn_h=bn_h, bn_heads=bn_heads, bias_out=bias_out)


@functools.partial(jax.jit, static_argnames=("channels", "size_in", "size_emb"))
def vae_forward(x_nchw, eps, packed, *, channels, size_in, size_emb):
    n = x_nchw.shape[0]
    d = channels * size_in * size_in
    dp, hp = packed["w_enc"].shape
    ep = packed["w_dec"].shape[0]

    # Same flattening as torch .view; pad/cast for lane-dense bf16 MXU tiles.
    x_flat = x_nchw.reshape(n, d)
    x_flat = jnp.pad(x_flat, ((0, 0), (0, dp - d))).astype(jnp.bfloat16)
    eps_pad = jnp.pad(eps, ((0, 0), (0, ep - size_emb))).astype(jnp.float32)

    ordered = [
        x_flat, eps_pad,
        packed["w_enc"], packed["w_heads"], packed["w_dec"], packed["w_out"],
        packed["bn_h"], packed["bn_heads"], packed["bias_out"],
    ]

    vmem = pl.BlockSpec(memory_space=pltpu.MemorySpace.VMEM)
    heads, recon_flat = pl.pallas_call(
        vae_forward_kernel,
        out_shape=(
            jax.ShapeDtypeStruct((n, 2 * ep), jnp.float32),   # fused mu|logvar
            jax.ShapeDtypeStruct((n, dp), jnp.float32),       # reconstruction
        ),
        in_specs=[vmem] * len(ordered),
        out_specs=(vmem, vmem),
        compiler_params=pltpu.CompilerParams(vmem_limit_bytes=32 << 20),
    )(*ordered)

    mu = heads[:, :size_emb]
    logvar = heads[:, ep:ep + size_emb]
    recon = recon_flat[:, :d].reshape(n, channels, size_in, size_in)
    return recon, mu, logvar


if __name__ == "__main__":
    N, C, S = 2, 3, 16          # batch=2, channels=3, 16x16 images
    EMB, HID = 5, 400

    key = jax.random.PRNGKey(0)
    k_x, k_eps, k_params = jax.random.split(key, 3)

    x = jax.random.uniform(k_x, (N, C, S, S), jnp.float32)      # image in [0, 1)
    eps = jax.random.normal(k_eps, (N, EMB), jnp.float32)       # reparam noise
    raw = init_vae_params(k_params, size_in=S, size_emb=EMB, hidden=HID, channels=C)
    packed = pack_vae_params(raw, size_emb=EMB, hidden=HID, d_in=C * S * S)

    recon, mu, logvar = vae_forward(x, eps, packed,
                                    channels=C, size_in=S, size_emb=EMB)
    jax.block_until_ready((recon, mu, logvar))

    assert recon.shape == (N, C, S, S)
    assert mu.shape == (N, EMB) and logvar.shape == (N, EMB)
    assert bool(jnp.all(jnp.isfinite(recon)))
    assert bool(jnp.all((recon >= 0.0) & (recon <= 1.0)))
    assert bool(jnp.all(jnp.isfinite(mu))) and bool(jnp.all(jnp.isfinite(logvar)))
    print("KERNEL_OK")
</pallas_src>

<mosaic_0001>
module attributes {stable_mosaic.version = 11 : i64} {
  func.func @vae_forward_kernel(%arg0: memref<2x768xbf16, #tpu.memory_space<vmem>>, %arg1: memref<2x128xf32, #tpu.memory_space<vmem>>, %arg2: memref<768x512xbf16, #tpu.memory_space<vmem>>, %arg3: memref<512x256xf32, #tpu.memory_space<vmem>>, %arg4: memref<128x512xf32, #tpu.memory_space<vmem>>, %arg5: memref<512x768xbf16, #tpu.memory_space<vmem>>, %arg6: memref<4x512xf32, #tpu.memory_space<vmem>>, %arg7: memref<2x256xf32, #tpu.memory_space<vmem>>, %arg8: memref<1x768xf32, #tpu.memory_space<vmem>>, %arg9: memref<2x256xf32, #tpu.memory_space<vmem>>, %arg10: memref<2x768xf32, #tpu.memory_space<vmem>>) attributes {dimension_semantics = [], scalar_prefetch = 0 : i64, scratch_operands = 0 : i64, tpu.core_type = #tpu.core_type<tc>} {
    %c0 = arith.constant 0 : index
    %c0_0 = arith.constant 0 : index
    %0 = vector.load %arg6[%c0, %c0_0] : memref<4x512xf32, #tpu.memory_space<vmem>>, vector<4x512xf32>
    %c0_1 = arith.constant 0 : index
    %c0_2 = arith.constant 0 : index
    %1 = vector.load %arg7[%c0_1, %c0_2] : memref<2x256xf32, #tpu.memory_space<vmem>>, vector<2x256xf32>
    %c0_3 = arith.constant 0 : index
    %c0_4 = arith.constant 0 : index
    %2 = vector.load %arg0[%c0_3, %c0_4] : memref<2x768xbf16, #tpu.memory_space<vmem>>, vector<2x768xbf16>
    %c0_5 = arith.constant 0 : index
    %c0_6 = arith.constant 0 : index
    %3 = vector.load %arg2[%c0_5, %c0_6] : memref<768x512xbf16, #tpu.memory_space<vmem>>, vector<768x512xbf16>
    %cst = arith.constant dense<0.000000e+00> : vector<2x512xf32>
    %4 = tpu.matmul %2, %3, %cst {dimension_numbers = #tpu.dot_dimension_numbers<[1], [0], [0], [1], [0, 0, 1, 1], [], []>} : vector<2x768xbf16>, vector<768x512xbf16>, vector<2x512xf32> -> vector<2x512xf32>
    %cst_7 = arith.constant 0.000000e+00 : f32
    %5 = vector.broadcast %cst_7 : f32 to vector<2x512xf32>
    %6 = arith.maximumf %4, %5 : vector<2x512xf32>
    %7 = vector.extract_strided_slice %0 {offsets = [0, 0], sizes = [1, 512], strides = [1, 1]} : vector<4x512xf32> to vector<1x512xf32>
    %8 = vector.extract_strided_slice %0 {offsets = [1, 0], sizes = [1, 512], strides = [1, 1]} : vector<4x512xf32> to vector<1x512xf32>
    %cst_8 = arith.constant dense<0.000000e+00> : vector<512xf32>
    %9 = vector.multi_reduction <add>, %6, %cst_8 [0] : vector<2x512xf32> to vector<512xf32>
    %10 = vector.shape_cast %9 : vector<512xf32> to vector<1x512xf32>
    %cst_9 = arith.constant 2.000000e+00 : f32
    %11 = vector.broadcast %cst_9 : f32 to vector<1x512xf32>
    %12 = arith.divf %10, %11 : vector<1x512xf32>
    %13 = vector.broadcast %12 : vector<1x512xf32> to vector<2x512xf32>
    %14 = arith.subf %6, %13 : vector<2x512xf32>
    %15 = arith.mulf %14, %14 : vector<2x512xf32>
    %cst_10 = arith.constant dense<0.000000e+00> : vector<512xf32>
    %16 = vector.multi_reduction <add>, %15, %cst_10 [0] : vector<2x512xf32> to vector<512xf32>
    %17 = vector.shape_cast %16 : vector<512xf32> to vector<1x512xf32>
    %cst_11 = arith.constant 2.000000e+00 : f32
    %18 = vector.broadcast %cst_11 : f32 to vector<1x512xf32>
    %19 = arith.divf %17, %18 : vector<1x512xf32>
    %20 = vector.broadcast %7 : vector<1x512xf32> to vector<2x512xf32>
    %21 = arith.mulf %20, %14 : vector<2x512xf32>
    %cst_12 = arith.constant 9.99999974E-6 : f32
    %22 = vector.broadcast %cst_12 : f32 to vector<1x512xf32>
    %23 = arith.addf %19, %22 : vector<1x512xf32>
    %24 = math.rsqrt %23 : vector<1x512xf32>
    %25 = vector.broadcast %24 : vector<1x512xf32> to vector<2x512xf32>
    %26 = arith.mulf %21, %25 : vector<2x512xf32>
    %27 = vector.broadcast %8 : vector<1x512xf32> to vector<2x512xf32>
    %28 = arith.addf %26, %27 : vector<2x512xf32>
    %c0_13 = arith.constant 0 : index
    %c0_14 = arith.constant 0 : index
    %29 = vector.load %arg3[%c0_13, %c0_14] : memref<512x256xf32, #tpu.memory_space<vmem>>, vector<512x256xf32>
    %cst_15 = arith.constant dense<0.000000e+00> : vector<2x256xf32>
    %30 = tpu.matmul %28, %29, %cst_15 {dimension_numbers = #tpu.dot_dimension_numbers<[1], [0], [0], [1], [0, 0, 1, 1], [], []>} : vector<2x512xf32>, vector<512x256xf32>, vector<2x256xf32> -> vector<2x256xf32>
    %31 = vector.extract_strided_slice %1 {offsets = [0, 0], sizes = [1, 256], strides = [1, 1]} : vector<2x256xf32> to vector<1x256xf32>
    %32 = vector.extract_strided_slice %1 {offsets = [1, 0], sizes = [1, 256], strides = [1, 1]} : vector<2x256xf32> to vector<1x256xf32>
    %cst_16 = arith.constant dense<0.000000e+00> : vector<256xf32>
    %33 = vector.multi_reduction <add>, %30, %cst_16 [0] : vector<2x256xf32> to vector<256xf32>
    %34 = vector.shape_cast %33 : vector<256xf32> to vector<1x256xf32>
    %cst_17 = arith.constant 2.000000e+00 : f32
    %35 = vector.broadcast %cst_17 : f32 to vector<1x256xf32>
    %36 = arith.divf %34, %35 : vector<1x256xf32>
    %37 = vector.broadcast %36 : vector<1x256xf32> to vector<2x256xf32>
    %38 = arith.subf %30, %37 : vector<2x256xf32>
    %39 = arith.mulf %38, %38 : vector<2x256xf32>
    %cst_18 = arith.constant dense<0.000000e+00> : vector<256xf32>
    %40 = vector.multi_reduction <add>, %39, %cst_18 [0] : vector<2x256xf32> to vector<256xf32>
    %41 = vector.shape_cast %40 : vector<256xf32> to vector<1x256xf32>
    %cst_19 = arith.constant 2.000000e+00 : f32
    %42 = vector.broadcast %cst_19 : f32 to vector<1x256xf32>
    %43 = arith.divf %41, %42 : vector<1x256xf32>
    %44 = vector.broadcast %31 : vector<1x256xf32> to vector<2x256xf32>
    %45 = arith.mulf %44, %38 : vector<2x256xf32>
    %cst_20 = arith.constant 9.99999974E-6 : f32
    %46 = vector.broadcast %cst_20 : f32 to vector<1x256xf32>
    %47 = arith.addf %43, %46 : vector<1x256xf32>
    %48 = math.rsqrt %47 : vector<1x256xf32>
    %49 = vector.broadcast %48 : vector<1x256xf32> to vector<2x256xf32>
    %50 = arith.mulf %45, %49 : vector<2x256xf32>
    %51 = vector.broadcast %32 : vector<1x256xf32> to vector<2x256xf32>
    %52 = arith.addf %50, %51 : vector<2x256xf32>
    %c0_21 = arith.constant 0 : index
    %c0_22 = arith.constant 0 : index
    %53 = vector.load %arg9[%c0_21, %c0_22] : memref<2x256xf32, #tpu.memory_space<vmem>>, vector<2x256xf32>
    tpu.vector_store %arg9[%c0_21, %c0_22], %52 {strides = array<i32>} : memref<2x256xf32, #tpu.memory_space<vmem>>, vector<2x256xf32>,
    %54 = vector.extract_strided_slice %52 {offsets = [0, 0], sizes = [2, 128], strides = [1, 1]} : vector<2x256xf32> to vector<2x128xf32>
    %55 = vector.extract_strided_slice %52 {offsets = [0, 128], sizes = [2, 128], strides = [1, 1]} : vector<2x256xf32> to vector<2x128xf32>
    %c0_23 = arith.constant 0 : index
    %c0_24 = arith.constant 0 : index
    %56 = vector.load %arg1[%c0_23, %c0_24] : memref<2x128xf32, #tpu.memory_space<vmem>>, vector<2x128xf32>
    %cst_25 = arith.constant 5.000000e-01 : f32
    %57 = vector.broadcast %cst_25 : f32 to vector<2x128xf32>
    %58 = arith.mulf %57, %55 : vector<2x128xf32>
    %59 = math.exp %58 : vector<2x128xf32>
    %60 = arith.mulf %56, %59 : vector<2x128xf32>
    %61 = arith.addf %54, %60 : vector<2x128xf32>
    %c0_26 = arith.constant 0 : index
    %c0_27 = arith.constant 0 : index
    %62 = vector.load %arg4[%c0_26, %c0_27] : memref<128x512xf32, #tpu.memory_space<vmem>>, vector<128x512xf32>
    %cst_28 = arith.constant dense<0.000000e+00> : vector<2x512xf32>
    %63 = tpu.matmul %61, %62, %cst_28 {dimension_numbers = #tpu.dot_dimension_numbers<[1], [0], [0], [1], [0, 0, 1, 1], [], []>} : vector<2x128xf32>, vector<128x512xf32>, vector<2x512xf32> -> vector<2x512xf32>
    %cst_29 = arith.constant 0.000000e+00 : f32
    %64 = vector.broadcast %cst_29 : f32 to vector<2x512xf32>
    %65 = arith.maximumf %63, %64 : vector<2x512xf32>
    %66 = vector.extract_strided_slice %0 {offsets = [2, 0], sizes = [1, 512], strides = [1, 1]} : vector<4x512xf32> to vector<1x512xf32>
    %67 = vector.extract_strided_slice %0 {offsets = [3, 0], sizes = [1, 512], strides = [1, 1]} : vector<4x512xf32> to vector<1x512xf32>
    %cst_30 = arith.constant dense<0.000000e+00> : vector<512xf32>
    %68 = vector.multi_reduction <add>, %65, %cst_30 [0] : vector<2x512xf32> to vector<512xf32>
    %69 = vector.shape_cast %68 : vector<512xf32> to vector<1x512xf32>
    %cst_31 = arith.constant 2.000000e+00 : f32
    %70 = vector.broadcast %cst_31 : f32 to vector<1x512xf32>
    %71 = arith.divf %69, %70 : vector<1x512xf32>
    %72 = vector.broadcast %71 : vector<1x512xf32> to vector<2x512xf32>
    %73 = arith.subf %65, %72 : vector<2x512xf32>
    %74 = arith.mulf %73, %73 : vector<2x512xf32>
    %cst_32 = arith.constant dense<0.000000e+00> : vector<512xf32>
    %75 = vector.multi_reduction <add>, %74, %cst_32 [0] : vector<2x512xf32> to vector<512xf32>
    %76 = vector.shape_cast %75 : vector<512xf32> to vector<1x512xf32>
    %cst_33 = arith.constant 2.000000e+00 : f32
    %77 = vector.broadcast %cst_33 : f32 to vector<1x512xf32>
    %78 = arith.divf %76, %77 : vector<1x512xf32>
    %79 = vector.broadcast %66 : vector<1x512xf32> to vector<2x512xf32>
    %80 = arith.mulf %79, %73 : vector<2x512xf32>
    %cst_34 = arith.constant 9.99999974E-6 : f32
    %81 = vector.broadcast %cst_34 : f32 to vector<1x512xf32>
    %82 = arith.addf %78, %81 : vector<1x512xf32>
    %83 = math.rsqrt %82 : vector<1x512xf32>
    %84 = vector.broadcast %83 : vector<1x512xf32> to vector<2x512xf32>
    %85 = arith.mulf %80, %84 : vector<2x512xf32>
    %86 = vector.broadcast %67 : vector<1x512xf32> to vector<2x512xf32>
    %87 = arith.addf %85, %86 : vector<2x512xf32>
    %88 = arith.truncf %87 : vector<2x512xf32> to vector<2x512xbf16>
    %c0_35 = arith.constant 0 : index
    %c0_36 = arith.constant 0 : index
    %89 = vector.load %arg5[%c0_35, %c0_36] : memref<512x768xbf16, #tpu.memory_space<vmem>>, vector<512x768xbf16>
    %cst_37 = arith.constant dense<0.000000e+00> : vector<2x768xf32>
    %90 = tpu.matmul %88, %89, %cst_37 {dimension_numbers = #tpu.dot_dimension_numbers<[1], [0], [0], [1], [0, 0, 1, 1], [], []>} : vector<2x512xbf16>, vector<512x768xbf16>, vector<2x768xf32> -> vector<2x768xf32>
    %c0_38 = arith.constant 0 : index
    %c0_39 = arith.constant 0 : index
    %91 = vector.load %arg8[%c0_38, %c0_39] : memref<1x768xf32, #tpu.memory_space<vmem>>, vector<1x768xf32>
    %92 = vector.broadcast %91 : vector<1x768xf32> to vector<2x768xf32>
    %93 = arith.addf %90, %92 : vector<2x768xf32>
    %94 = arith.negf %93 : vector<2x768xf32>
    %95 = math.exp %94 : vector<2x768xf32>
    %cst_40 = arith.constant 1.000000e+00 : f32
    %96 = vector.broadcast %cst_40 : f32 to vector<2x768xf32>
    %97 = arith.addf %96, %95 : vector<2x768xf32>
    %98 = arith.divf %96, %97 : vector<2x768xf32>
    %c0_41 = arith.constant 0 : index
    %c0_42 = arith.constant 0 : index
    %99 = vector.load %arg10[%c0_41, %c0_42] : memref<2x768xf32, #tpu.memory_space<vmem>>, vector<2x768xf32>
    tpu.vector_store %arg10[%c0_41, %c0_42], %98 {strides = array<i32>} : memref<2x768xf32, #tpu.memory_space<vmem>>, vector<2x768xf32>,
    return
  }
}

</mosaic_0001>

<bundles_post_ra>
// kernel: vae_forward.1
= control target key start
LH: loop header
LB: loop body
LE: loop exit
PB: predicated region body
PF: predicated region fallthrough
CT: control target
= control target key end

     0   :  { %16 = vsyncpa [#allocation3], 0  ;;  %s5392_s0 = inlined_call_operand.vmem [shape: bf16[2,768], index: 0, kind: input, shape index: {}]   ;;  %s5393_s1 = inlined_call_operand.vmem [shape: f32[2,128], index: 1, kind: input, shape index: {}]   ;;  %s5394_s2 = inlined_call_operand.hbm [shape: bf16[768,512], index: 2, kind: input, shape index: {}]   ;;  %s5395_s3 = inlined_call_operand.hbm [shape: f32[512,256], index: 3, kind: input, shape index: {}]   ;;  %s5396_s4 = inlined_call_operand.hbm [shape: f32[128,512], index: 4, kind: input, shape index: {}]   ;;  %s5397_s5 = inlined_call_operand.hbm [shape: bf16[512,768], index: 5, kind: input, shape index: {}]   ;;  %s5398_s6 = inlined_call_operand.vmem [shape: f32[4,512], index: 6, kind: input, shape index: {}]   ;;  %s5399_s7 = inlined_call_operand.vmem [shape: f32[2,256], index: 7, kind: input, shape index: {}]   ;;  %s5400_s8 = inlined_call_operand.vmem [shape: f32[1,768], index: 8, kind: input, shape index: {}]   ;;  %s5401_s9 = inlined_call_operand.vmem [shape: f32[2,256], index: 9, kind: output, shape index: {0}]   ;;  %s5402_s10 = inlined_call_operand.vmem [shape: f32[2,768], index: 10, kind: output, shape index: {1}]  }
   0x1   :  { %17 = vsyncpa [#allocation5], 0 }
   0x2   :  { %18 = vsyncpa [#allocation8], 0  ;;  %s5093_s13 = smov [#allocation4]   ;;  %s5094_s15 = smov [#allocation2]  }
   0x3   :  { %s40_s14 = sshll.u32 %s5093_s13, 4  ;;  %s28_s16 = sshll.u32 %s5094_s15, 4  ;;  %s41_s14 = int_to_ptr.vmem [resolvable:$true] %s40_s14  ;;  %s29_s16 = int_to_ptr.vmem [resolvable:$true] %s28_s16 }
   0x4   :  { %s5015_s17 = scalar_lea.vmem %s41_s14, 16384  ;;  %p5020_p1 = scmp.lt.s32.totalorder %s41_s14, %s41_s14 }
   0x5   :  { %p5016_p0 = scmp.ne.s32.totalorder %s41_s14, %s5015_s17  ;;  %p5021_p2 = scmp.lt.s32.totalorder %s5015_s17, %s5015_s17 }
   0x7   :  { %p5022_p3 = por %p5021_p2, %p5020_p1 }
   0x9   :  { %p5023_p4 = pnand %p5022_p3, %p5016_p0 }
   0xb   :  { %5026 = shalt.err (!%p5023_p4)
}
   0xc   :  { %s5095_s18 = smov 256   ;;  %s5096_s19 = smov 16  }
   0xd   :  { %46 = dma.hbm_to_vmem [thread:$0]  %s5395_s3, 16384, %s41_s14, [#allocation5], %s5095_s18, %s5095_s18, %s5096_s19  }
   0xe   :  { %s5035_s22 = scalar_lea.vmem %s29_s16, 24576  ;;  %p5040_p6 = scmp.lt.s32.totalorder %s29_s16, %s29_s16 }
   0xf   :  { %p5036_p5 = scmp.ne.s32.totalorder %s29_s16, %s5035_s22  ;;  %p5041_p7 = scmp.lt.s32.totalorder %s5035_s22, %s5035_s22 }
  0x11   :  { %p5042_p8 = por %p5041_p7, %p5040_p6 }
  0x13   :  { %p5043_p9 = pnand %p5042_p8, %p5036_p5 }
  0x15   :  { %5046 = shalt.err (!%p5043_p9)
}
  0x16   :  { %34 = dma.hbm_to_vmem [thread:$0]  %s5394_s2, 24576, %s29_s16, [#allocation3], %s5095_s18, %s5095_s18, %s5096_s19  }
  0x17   :  { %s5097_s25 = smov [#allocation6]  }
  0x18   :  { %s52_s26 = sshll.u32 %s5097_s25, 4  ;;  %s53_s26 = int_to_ptr.vmem [resolvable:$true] %s52_s26 }
  0x19   :  { %s5055_s27 = scalar_lea.vmem %s53_s26, 8192  ;;  %p5060_p11 = scmp.lt.s32.totalorder %s53_s26, %s53_s26 }
  0x1a   :  { %p5056_p10 = scmp.ne.s32.totalorder %s53_s26, %s5055_s27  ;;  %p5061_p12 = scmp.lt.s32.totalorder %s5055_s27, %s5055_s27 }
  0x1c   :  { %p5062_p13 = por %p5061_p12, %p5060_p11 }
  0x1e   :  { %p5063_p0 = pnand %p5062_p13, %p5056_p10 }
  0x20   :  { %5066 = shalt.err (!%p5063_p0)
}
  0x21   :  { %s5098_s3 = smov 512   ;;  %s5099_s28 = smov 32  }
  0x22   :  { %58 = dma.hbm_to_vmem [thread:$0]  %s5396_s4, 8192, %s53_s26, [#allocation5], %s5098_s3, %s5098_s3, %s5099_s28  }
  0x23   :  { %s5100_s11 = smov [#allocation7]  }
  0x24   :  { %s64_s12 = sshll.u32 %s5100_s11, 4  ;;  %s65_s12 = int_to_ptr.vmem [resolvable:$true] %s64_s12 }
  0x25   :  { %s5075_s2 = scalar_lea.vmem %s65_s12, 24576  ;;  %p5080_p2 = scmp.lt.s32.totalorder %s65_s12, %s65_s12 }
  0x26   :  { %p5076_p1 = scmp.ne.s32.totalorder %s65_s12, %s5075_s2  ;;  %p5081_p3 = scmp.lt.s32.totalorder %s5075_s2, %s5075_s2 }
  0x28   :  { %p5082_p4 = por %p5081_p3, %p5080_p2 }
  0x2a   :  { %p5083_p5 = pnand %p5082_p4, %p5076_p1 }
  0x2c   :  { %5086 = shalt.err (!%p5083_p5)
}
  0x2d   :  { %s5101_s13 = smov 384   ;;  %s5102_s14 = smov 24  }
  0x2e   :  { %70 = dma.hbm_to_vmem [thread:$0]  %s5397_s5, 24576, %s65_s12, [#allocation8], %s5101_s13, %s5101_s13, %s5102_s14  }
  0x2f   :  { %5087 = dma.done.wait [#allocation3], 24576  }
  0x30   :  { %5088 = vsyncadd [#allocation3], 4294942720 }
  0x31   :  { %5089 = dma.done.wait [#allocation5], 24576  }
  0x32   :  { %5090 = vsyncadd [#allocation5], 4294942720 }
  0x33   :  { %5091 = dma.done.wait [#allocation8], 24576  }
  0x34   :  { %5092 = vsyncadd [#allocation8], 4294942720  ;;  %v4383_v0 = vld [vmem:[#allocation2 + $0xe4] ss:$16 sps:$4 sm:$0xff]   ;;  %v4387_v2 = vld [vmem:[#allocation2 + $0xe0] ss:$16 sps:$4 sm:$0xff]   ;;  %v290_v38 = vlaneseq }
  0x35   :  { %v4385_v1 = vld [vmem:[#allocation2 + $0x2e4] ss:$16 sps:$4 sm:$0xff]   ;;  %1299 = vmatprep.subr.bf16.mxu0 %v4383_v0  ;;  %v4388_v3 = vld [vmem:[#allocation2 + $0x2e0] ss:$16 sps:$4 sm:$0xff]   ;;  %v5103_v36 = vmov 1966171168  }
  0x36   :  { %1340 = vmatprep.subr.bf16.mxu1 %v4385_v1  ;;  %v4389_v4 = vld [vmem:[#allocation2 + $0xc4] ss:$16 sps:$4 sm:$0xff]   ;;  %1300 = vmatpush1.bf16.msra.mxu0 %v4387_v2  ;;  %v4393_v6 = vld [vmem:[#allocation2 + $0xc0] ss:$16 sps:$4 sm:$0xff]   ;;  %v288_v37 = vunpack.c.l.s4 %v5103_v36  ;;  %v5173_v43 = vshrl.u32 %v290_v38, 7  ;;  %vm1549_vm0 = vcmask 1041408  }
  0x37   :  { %1341 = vmatpush1.bf16.msra.mxu1 %v4388_v3  ;;  %v4391_v5 = vld [vmem:[#allocation2 + $0x2c4] ss:$16 sps:$4 sm:$0xff]   ;;  %1301 = vmatprep.subr.bf16.mxu0 %v4389_v4  ;;  %v4394_v7 = vld [vmem:[#allocation2 + $0x2c0] ss:$16 sps:$4 sm:$0xff]  }
  0x38   :  { %1342 = vmatprep.subr.bf16.mxu1 %v4391_v5  ;;  %v4395_v8 = vld [vmem:[#allocation2 + $0xa4] ss:$16 sps:$4 sm:$0xff]   ;;  %v4399_v10 = vld [vmem:[#allocation2 + $0xa0] ss:$16 sps:$4 sm:$0xff]   ;;  %v289_v42 = vunpack.c.0.s8 %v288_v37  ;;  %v4506_v37 = vld [vmem:[#allocation2 + $0x68] ss:$16 sps:$4 sm:$0xff]  }
  0x39   :  { %v4397_v9 = vld [vmem:[#allocation2 + $0x2a4] ss:$16 sps:$4 sm:$0xff]   ;;  %v4400_v11 = vld [vmem:[#allocation2 + $0x2a0] ss:$16 sps:$4 sm:$0xff]  }
  0x3a   :  { %1302 = vmatpush1.bf16.msra.mxu0 %v4393_v6  ;;  %v4401_v12 = vld [vmem:[#allocation2 + $0x84] ss:$16 sps:$4 sm:$0xff]   ;;  %v4405_v14 = vld [vmem:[#allocation2 + $0x80] ss:$16 sps:$4 sm:$0xff]   ;;  %v5176_v49 = vsub.s32 %v289_v42, %v5173_v43 }
  0x3b   :  { %1343 = vmatpush1.bf16.msra.mxu1 %v4394_v7  ;;  %1303 = vmatprep.subr.bf16.mxu0 %v4395_v8  ;;  %v4403_v13 = vld [vmem:[#allocation2 + $0x284] ss:$16 sps:$4 sm:$0xff]   ;;  %v4406_v15 = vld [vmem:[#allocation2 + $0x280] ss:$16 sps:$4 sm:$0xff]  }
  0x3c   :  { %1344 = vmatprep.subr.bf16.mxu1 %v4397_v9  ;;  %v4407_v16 = vld [vmem:[#allocation2 + $0x64] ss:$16 sps:$4 sm:$0xff]   ;;  %v4411_v18 = vld [vmem:[#allocation2 + $0x60] ss:$16 sps:$4 sm:$0xff]  }
  0x3d   :  { %v4409_v17 = vld [vmem:[#allocation2 + $0x264] ss:$16 sps:$4 sm:$0xff]   ;;  %v4412_v19 = vld [vmem:[#allocation2 + $0x260] ss:$16 sps:$4 sm:$0xff]  }
  0x3e   :  { %1304 = vmatpush1.bf16.msra.mxu0 %v4399_v10  ;;  %v4413_v20 = vld [vmem:[#allocation2 + $0x44] ss:$16 sps:$4 sm:$0xff]   ;;  %v4417_v22 = vld [vmem:[#allocation2 + $0x40] ss:$16 sps:$4 sm:$0xff]  }
  0x3f   :  { %1345 = vmatpush1.bf16.msra.mxu1 %v4400_v11  ;;  %1305 = vmatprep.subr.bf16.mxu0 %v4401_v12  ;;  %v4415_v21 = vld [vmem:[#allocation2 + $0x244] ss:$16 sps:$4 sm:$0xff]   ;;  %v4418_v23 = vld [vmem:[#allocation2 + $0x240] ss:$16 sps:$4 sm:$0xff]  }
  0x40   :  { %1346 = vmatprep.subr.bf16.mxu1 %v4403_v13  ;;  %v4419_v24 = vld [vmem:[#allocation2 + $0x24] ss:$16 sps:$4 sm:$0xff]   ;;  %v4423_v26 = vld [vmem:[#allocation2 + $0x20] ss:$16 sps:$4 sm:$0xff]  }
  0x41   :  { %v4421_v25 = vld [vmem:[#allocation2 + $0x224] ss:$16 sps:$4 sm:$0xff]   ;;  %v4424_v27 = vld [vmem:[#allocation2 + $0x220] ss:$16 sps:$4 sm:$0xff]  }
  0x42   :  { %1306 = vmatpush1.bf16.msra.mxu0 %v4405_v14  ;;  %v4425_v28 = vld [vmem:[#allocation2 + $0x4] ss:$16 sps:$4 sm:$0xff]   ;;  %v4429_v30 = vld [vmem:[#allocation2] ss:$16 sps:$4 sm:$0xff]  }
  0x43   :  { %1347 = vmatpush1.bf16.msra.mxu1 %v4406_v15  ;;  %1307 = vmatprep.subr.bf16.mxu0 %v4407_v16  ;;  %v4427_v29 = vld [vmem:[#allocation2 + $0x204] ss:$16 sps:$4 sm:$0xff]   ;;  %v4430_v31 = vld [vmem:[#allocation2 + $0x200] ss:$16 sps:$4 sm:$0xff]   ;;  %v4484_v16 = vld [vmem:[#allocation2 + $0xec] ss:$16 sps:$4 sm:$0xff]  }
  0x44   :  { %1348 = vmatprep.subr.bf16.mxu1 %v4409_v17  ;;  %v4431_v32 = vld [vmem:[#allocation2 + $0x1e4] ss:$16 sps:$4 sm:$0xff]   ;;  %v4435_v34 = vld [vmem:[#allocation2 + $0x1e0] ss:$16 sps:$4 sm:$0xff]  }
  0x45   :  { %v4433_v33 = vld [vmem:[#allocation2 + $0x3e4] ss:$16 sps:$4 sm:$0xff]   ;;  %v4436_v35 = vld [vmem:[#allocation2 + $0x3e0] ss:$16 sps:$4 sm:$0xff]  }
  0x46   :  { %1308 = vmatpush1.bf16.msra.mxu0 %v4411_v18  ;;  %v4437_v39 = vld [vmem:[#allocation2 + $0x1c4] ss:$16 sps:$4 sm:$0xff]   ;;  %v4441_v41 = vld [vmem:[#allocation2 + $0x1c0] ss:$16 sps:$4 sm:$0xff]  }
  0x47   :  { %1349 = vmatpush1.bf16.msra.mxu1 %v4412_v19  ;;  %1309 = vmatprep.subr.bf16.mxu0 %v4413_v20  ;;  %v4439_v40 = vld [vmem:[#allocation2 + $0x3c4] ss:$16 sps:$4 sm:$0xff]   ;;  %v4442_v44 = vld [vmem:[#allocation2 + $0x3c0] ss:$16 sps:$4 sm:$0xff]   ;;  %v4482_v20 = vld [vmem:[#allocation2 + $0xe8] ss:$16 sps:$4 sm:$0xff]  }
  0x48   :  { %1350 = vmatprep.subr.bf16.mxu1 %v4415_v21  ;;  %v4443_v45 = vld [vmem:[#allocation2 + $0x1a4] ss:$16 sps:$4 sm:$0xff]   ;;  %v4447_v47 = vld [vmem:[#allocation2 + $0x1a0] ss:$16 sps:$4 sm:$0xff]  }
  0x49   :  { %v4445_v46 = vld [vmem:[#allocation2 + $0x3a4] ss:$16 sps:$4 sm:$0xff]   ;;  %v4448_v48 = vld [vmem:[#allocation2 + $0x3a0] ss:$16 sps:$4 sm:$0xff]  }
  0x4a   :  { %1310 = vmatpush1.bf16.msra.mxu0 %v4417_v22  ;;  %v4449_v50 = vld [vmem:[#allocation2 + $0x184] ss:$16 sps:$4 sm:$0xff]   ;;  %v4453_v53 = vld [vmem:[#allocation2 + $0x180] ss:$16 sps:$4 sm:$0xff]   ;;  %v4490_v22 = vld [vmem:[#allocation2 + $0xcc] ss:$16 sps:$4 sm:$0xff]  }
  0x4b   :  { %1351 = vmatpush1.bf16.msra.mxu1 %v4418_v23  ;;  %1311 = vmatprep.subr.bf16.mxu0 %v4419_v24  ;;  %v4451_v51 = vld [vmem:[#allocation2 + $0x384] ss:$16 sps:$4 sm:$0xff]   ;;  %v4454_v56 = vld [vmem:[#allocation2 + $0x380] ss:$16 sps:$4 sm:$0xff]  }
  0x4c   :  { %1352 = vmatprep.subr.bf16.mxu1 %v4421_v25  ;;  %v92_v52 = vld [vmem:[%s5392_s0] sm:$0x3f]  ;;  %v4488_v25 = vld [vmem:[#allocation2 + $0xc8] ss:$16 sps:$4 sm:$0xff]  }
  0x4d   :  { %v293_v54 = vrot.slane %v92_v52, %v5176_v49  ;;  %v286_v55 = vcombine.high %v92_v52, %v92_v52  ;;  %v4455_v57 = vld [vmem:[#allocation2 + $0x164] ss:$16 sps:$4 sm:$0xff]   ;;  %v4459_v61 = vld [vmem:[#allocation2 + $0x160] ss:$16 sps:$4 sm:$0xff]   ;;  %v4532_v52 = vld [vmem:[#allocation2 + $0x1ec] ss:$16 sps:$4 sm:$0xff]  }
  0x4e   :  { %1312 = vmatpush1.bf16.msra.mxu0 %v4423_v26  ;;  %v4457_v58 = vld [vmem:[#allocation2 + $0x364] ss:$16 sps:$4 sm:$0xff]   ;;  %v4460_v0 = vld [vmem:[#allocation2 + $0x360] ss:$16 sps:$4 sm:$0xff]  }
  0x4f   :  { %1353 = vmatpush1.bf16.msra.mxu1 %v4424_v27  ;;  %1313 = vmatprep.subr.bf16.mxu0 %v4425_v28  ;;  %v301_v59 = vcombine.high %v293_v54, %v293_v54  ;;  %v300_v60 = vrot.slane %v286_v55, %v5176_v49  ;;  %v4461_v1 = vld [vmem:[#allocation2 + $0x144] ss:$16 sps:$4 sm:$0xff]   ;;  %v4465_v4 = vld [vmem:[#allocation2 + $0x140] ss:$16 sps:$4 sm:$0xff]   ;;  %v5191_v13 = vrot.slane %v293_v54, %v5176_v49  ;;  %v4496_v27 = vld [vmem:[#allocation2 + $0xac] ss:$16 sps:$4 sm:$0xff]  }
  0x50   :  { %1354 = vmatprep.subr.bf16.mxu1 %v4427_v29  ;;  %v4463_v2 = vld [vmem:[#allocation2 + $0x344] ss:$16 sps:$4 sm:$0xff]   ;;  %v4466_v5 = vld [vmem:[#allocation2 + $0x340] ss:$16 sps:$4 sm:$0xff]   ;;  %v4494_v29 = vld [vmem:[#allocation2 + $0xa8] ss:$16 sps:$4 sm:$0xff]  }
  0x51   :  { %v323_v62 = vrot.slane %v301_v59, %v5176_v49  ;;  %v5185_v63 = vrot.slane %v300_v60, %v5176_v49  ;;  %v4467_v6 = vld [vmem:[#allocation2 + $0x124] ss:$16 sps:$4 sm:$0xff]   ;;  %v4471_v8 = vld [vmem:[#allocation2 + $0x120] ss:$16 sps:$4 sm:$0xff]   ;;  %v302_v17 = vcombine.high %v300_v60, %v300_v60  ;;  %v5195_v18 = vcombine.high %v5191_v13, %v5191_v13  ;;  %v4530_v54 = vld [vmem:[#allocation2 + $0x1e8] ss:$16 sps:$4 sm:$0xff]  }
  0x52   :  { %1314 = vmatpush1.bf16.msra.mxu0 %v4429_v30  ;;  %v4469_v7 = vld [vmem:[#allocation2 + $0x324] ss:$16 sps:$4 sm:$0xff]   ;;  %v4472_v9 = vld [vmem:[#allocation2 + $0x320] ss:$16 sps:$4 sm:$0xff]   ;;  %v4544_v60 = vld [vmem:[#allocation2 + $0x1ac] ss:$16 sps:$4 sm:$0xff]  }
  0x53   :  { %1355 = vmatpush1.bf16.msra.mxu1 %v4430_v31  ;;  %1315 = vmatprep.subr.bf16.mxu0 %v4431_v32  ;;  %v5187_v3 = vcombine.high %v323_v62, %v323_v62  ;;  %v4473_v10 = vld [vmem:[#allocation2 + $0x104] ss:$16 sps:$4 sm:$0xff]   ;;  %v4477_v12 = vld [vmem:[#allocation2 + $0x100] ss:$16 sps:$4 sm:$0xff]   ;;  %v5198_v23 = vrot.slane %v302_v17, %v5176_v49  ;;  %v4502_v31 = vld [vmem:[#allocation2 + $0x8c] ss:$16 sps:$4 sm:$0xff]  }
  0x54   :  { %1356 = vmatprep.subr.bf16.mxu1 %v4433_v33  ;;  %1331 = vmatprep.mubr.bf16.mxu0 %v323_v62  ;;  %v4475_v11 = vld [vmem:[#allocation2 + $0x304] ss:$16 sps:$4 sm:$0xff]   ;;  %v4478_v14 = vld [vmem:[#allocation2 + $0x300] ss:$16 sps:$4 sm:$0xff]   ;;  %v4500_v33 = vld [vmem:[#allocation2 + $0x88] ss:$16 sps:$4 sm:$0xff]  }
  0x55   :  { %1372 = vmatprep.mubr.bf16.mxu1 %v5187_v3  ;;  %v4481_v15 = vld [vmem:[#allocation2 + $0x4e4] ss:$16 sps:$4 sm:$0xff]   ;;  %v4479_v19 = vld [vmem:[#allocation2 + $0x4e0] ss:$16 sps:$4 sm:$0xff]   ;;  %v4566_v17 = vld [vmem:[#allocation2 + $0x128] ss:$16 sps:$4 sm:$0xff]  }
  0x56   :  { %1316 = vmatpush2.bf16.msra.mxu0 %v4435_v34  ;;  %v4487_v21 = vld [vmem:[#allocation2 + $0x4c4] ss:$16 sps:$4 sm:$0xff]   ;;  %v4485_v24 = vld [vmem:[#allocation2 + $0x4c0] ss:$16 sps:$4 sm:$0xff]  }
  0x57   :  { %1357 = vmatpush2.bf16.msra.mxu1 %v4436_v35  ;;  %1317 = vmatprep.subr.bf16.mxu0 %v4437_v39  ;;  %v4493_v26 = vld [vmem:[#allocation2 + $0x4a4] ss:$16 sps:$4 sm:$0xff]   ;;  %v4491_v28 = vld [vmem:[#allocation2 + $0x4a0] ss:$16 sps:$4 sm:$0xff]   ;;  %v4508_v35 = vld [vmem:[#allocation2 + $0x6c] ss:$16 sps:$4 sm:$0xff]  }
  0x58   :  { %1358 = vmatprep.subr.bf16.mxu1 %v4439_v40  ;;  %v4499_v30 = vld [vmem:[#allocation2 + $0x484] ss:$16 sps:$4 sm:$0xff]   ;;  %v4497_v32 = vld [vmem:[#allocation2 + $0x480] ss:$16 sps:$4 sm:$0xff]   ;;  %v4514_v39 = vld [vmem:[#allocation2 + $0x4c] ss:$16 sps:$4 sm:$0xff]  }
  0x59   :  { %v4505_v34 = vld [vmem:[#allocation2 + $0x464] ss:$16 sps:$4 sm:$0xff]   ;;  %v4503_v36 = vld [vmem:[#allocation2 + $0x460] ss:$16 sps:$4 sm:$0xff]  }
  0x5a   :  { %1318 = vmatpush2.bf16.msra.mxu0 %v4441_v41  ;;  %v4511_v38 = vld [vmem:[#allocation2 + $0x444] ss:$16 sps:$4 sm:$0xff]   ;;  %v4509_v40 = vld [vmem:[#allocation2 + $0x440] ss:$16 sps:$4 sm:$0xff]   ;;  %v4512_v41 = vld [vmem:[#allocation2 + $0x48] ss:$16 sps:$4 sm:$0xff]  }
  0x5b   :  { %1359 = vmatpush2.bf16.msra.mxu1 %v4442_v44  ;;  %1319 = vmatprep.subr.bf16.mxu0 %v4443_v45  ;;  %v4517_v42 = vld [vmem:[#allocation2 + $0x424] ss:$16 sps:$4 sm:$0xff]   ;;  %v4520_v44 = vld [vmem:[#allocation2 + $0x2c] ss:$16 sps:$4 sm:$0xff]   ;;  %v4515_v45 = vld [vmem:[#allocation2 + $0x420] ss:$16 sps:$4 sm:$0xff]  }
  0x5c   :  { %1360 = vmatprep.subr.bf16.mxu1 %v4445_v46  ;;  %v4518_v46 = vld [vmem:[#allocation2 + $0x28] ss:$16 sps:$4 sm:$0xff]   ;;  %v4521_v49 = vld [vmem:[#allocation2 + $0x400] ss:$16 sps:$4 sm:$0xff]   ;;  %v4535_v55 = vld [vmem:[#allocation2 + $0x5c4] ss:$16 sps:$4 sm:$0xff]  }
  0x5d   :  { %v4541_v59 = vld [vmem:[#allocation2 + $0x5a4] ss:$16 sps:$4 sm:$0xff]  }
  0x5e   :  { %1320 = vmatpush2.bf16.msra.mxu0 %v4447_v47  ;;  %v4523_v47 = vld [vmem:[#allocation2 + $0x404] ss:$16 sps:$4 sm:$0xff]  }
  0x5f   :  { %1361 = vmatpush2.bf16.msra.mxu1 %v4448_v48  ;;  %1321 = vmatprep.subr.bf16.mxu0 %v4449_v50  ;;  %v4526_v48 = vld [vmem:[#allocation2 + $0xc] ss:$16 sps:$4 sm:$0xff]   ;;  %v4524_v50 = vld [vmem:[#allocation2 + $0x8] ss:$16 sps:$4 sm:$0xff]  }
  0x60   :  { %1362 = vmatprep.subr.bf16.mxu1 %v4451_v51  ;;  %v4529_v51 = vld [vmem:[#allocation2 + $0x5e4] ss:$16 sps:$4 sm:$0xff]  }
  0x62   :  { %1322 = vmatpush2.bf16.msra.mxu0 %v4453_v53  ;;  %v4527_v53 = vld [vmem:[#allocation2 + $0x5e0] ss:$16 sps:$4 sm:$0xff]  }
  0x63   :  { %1363 = vmatpush2.bf16.msra.mxu1 %v4454_v56  ;;  %1323 = vmatprep.subr.bf16.mxu0 %v4455_v57  ;;  %v4538_v56 = vld [vmem:[#allocation2 + $0x1cc] ss:$16 sps:$4 sm:$0xff]   ;;  %v4533_v57 = vld [vmem:[#allocation2 + $0x5c0] ss:$16 sps:$4 sm:$0xff]  }
  0x64   :  { %1364 = vmatprep.subr.bf16.mxu1 %v4457_v58  ;;  %v4536_v58 = vld [vmem:[#allocation2 + $0x1c8] ss:$16 sps:$4 sm:$0xff]  }
  0x66   :  { %1324 = vmatpush2.bf16.msra.mxu0 %v4459_v61  ;;  %v4539_v61 = vld [vmem:[#allocation2 + $0x5a0] ss:$16 sps:$4 sm:$0xff]  }
  0x67   :  { %1365 = vmatpush2.bf16.msra.mxu1 %v4460_v0  ;;  %1325 = vmatprep.subr.bf16.mxu0 %v4461_v1  ;;  %v4547_v0 = vld [vmem:[#allocation2 + $0x584] ss:$16 sps:$4 sm:$0xff]   ;;  %v4550_v1 = vld [vmem:[#allocation2 + $0x18c] ss:$16 sps:$4 sm:$0xff]  }
  0x68   :  { %1366 = vmatprep.subr.bf16.mxu1 %v4463_v2  ;;  %v4545_v2 = vld [vmem:[#allocation2 + $0x580] ss:$16 sps:$4 sm:$0xff]  }
  0x6a   :  { %1326 = vmatpush2.bf16.msra.mxu0 %v4465_v4  ;;  %v4548_v4 = vld [vmem:[#allocation2 + $0x188] ss:$16 sps:$4 sm:$0xff]  }
  0x6b   :  { %1367 = vmatpush2.bf16.msra.mxu1 %v4466_v5  ;;  %1327 = vmatprep.subr.bf16.mxu0 %v4467_v6  ;;  %v4553_v5 = vld [vmem:[#allocation2 + $0x564] ss:$16 sps:$4 sm:$0xff]   ;;  %v4556_v6 = vld [vmem:[#allocation2 + $0x16c] ss:$16 sps:$4 sm:$0xff]  }
  0x6c   :  { %1368 = vmatprep.subr.bf16.mxu1 %v4469_v7  ;;  %v4551_v7 = vld [vmem:[#allocation2 + $0x560] ss:$16 sps:$4 sm:$0xff]  }
  0x6e   :  { %1328 = vmatpush2.bf16.msra.mxu0 %v4471_v8  ;;  %v4554_v8 = vld [vmem:[#allocation2 + $0x168] ss:$16 sps:$4 sm:$0xff]  }
  0x6f   :  { %1369 = vmatpush2.bf16.msra.mxu1 %v4472_v9  ;;  %1329 = vmatprep.subr.bf16.mxu0 %v4473_v10  ;;  %v4559_v9 = vld [vmem:[#allocation2 + $0x544] ss:$16 sps:$4 sm:$0xff]   ;;  %v4562_v10 = vld [vmem:[#allocation2 + $0x14c] ss:$16 sps:$4 sm:$0xff]  }
  0x70   :  { %1370 = vmatprep.subr.bf16.mxu1 %v4475_v11  ;;  %v4557_v11 = vld [vmem:[#allocation2 + $0x540] ss:$16 sps:$4 sm:$0xff]  }
  0x72   :  { %1330 = vmatpush2.bf16.msra.mxu0 %v4477_v12  ;;  %v4560_v12 = vld [vmem:[#allocation2 + $0x148] ss:$16 sps:$4 sm:$0xff]  }
  0x73   :  { %1371 = vmatpush2.bf16.msra.mxu1 %v4478_v14  ;;  %1381 = vmatprep.subr.bf16.mxu0 %v4481_v15  ;;  %v4565_v14 = vld [vmem:[#allocation2 + $0x524] ss:$16 sps:$4 sm:$0xff]   ;;  %v4568_v15 = vld [vmem:[#allocation2 + $0x12c] ss:$16 sps:$4 sm:$0xff]  }
  0x74   :  { %1422 = vmatprep.subr.bf16.mxu1 %v4484_v16  ;;  %v4563_v16 = vld [vmem:[#allocation2 + $0x520] ss:$16 sps:$4 sm:$0xff]  }
  0x75   :  { %1332 = vmatmul.mubr.bf16.vlgmr.msra.gmra.mxu0 %v5191_v13 }
  0x76   :  { %1373 = vmatmul.mubr.bf16.vlgmr.msra.gmra.mxu1 %v5195_v18  ;;  %1382 = vmatpush1.bf16.msra.mxu0 %v4479_v19  ;;  %v4571_v19 = vld [vmem:[#allocation2 + $0x504] ss:$16 sps:$4 sm:$0xff]  }
  0x77   :  { %1423 = vmatpush1.bf16.msra.mxu1 %v4482_v20  ;;  %1383 = vmatprep.subr.bf16.mxu0 %v4487_v21  ;;  %v4574_v20 = vld [vmem:[#allocation2 + $0x10c] ss:$16 sps:$4 sm:$0xff]   ;;  %v4569_v21 = vld [vmem:[#allocation2 + $0x500] ss:$16 sps:$4 sm:$0xff]  }
  0x78   :  { %1424 = vmatprep.subr.bf16.mxu1 %v4490_v22  ;;  %1413 = vmatprep.mubr.bf16.mxu0 %v5198_v23  ;;  %v4572_v22 = vld [vmem:[#allocation2 + $0x108] ss:$16 sps:$4 sm:$0xff]  }
  0x79   :  { %1454 = vmatprep.mubr.bf16.mxu1 %v323_v62  ;;  %v4542_v62 = vld [vmem:[#allocation2 + $0x1a8] ss:$16 sps:$4 sm:$0xff]  }
  0x7a   :  { %1384 = vmatpush1.bf16.msra.mxu0 %v4485_v24  ;;  %v4578_v24 = vld [vmem:[#allocation2 + $0x2ec] ss:$16 sps:$4 sm:$0xff]  }
  0x7b   :  { %1425 = vmatpush1.bf16.msra.mxu1 %v4488_v25  ;;  %1385 = vmatprep.subr.bf16.mxu0 %v4493_v26  ;;  %v4581_v25 = vld [vmem:[#allocation2 + $0x4ec] ss:$16 sps:$4 sm:$0xff]   ;;  %v4576_v26 = vld [vmem:[#allocation2 + $0x2e8] ss:$16 sps:$4 sm:$0xff]  }
  0x7c   :  { %1426 = vmatprep.subr.bf16.mxu1 %v4496_v27  ;;  %v4579_v27 = vld [vmem:[#allocation2 + $0x4e8] ss:$16 sps:$4 sm:$0xff]  }
  0x7e   :  { %1386 = vmatpush1.bf16.msra.mxu0 %v4491_v28  ;;  %v4584_v28 = vld [vmem:[#allocation2 + $0x2cc] ss:$16 sps:$4 sm:$0xff]  }
  0x7f   :  { %1427 = vmatpush1.bf16.msra.mxu1 %v4494_v29  ;;  %1387 = vmatprep.subr.bf16.mxu0 %v4499_v30  ;;  %v4587_v29 = vld [vmem:[#allocation2 + $0x4cc] ss:$16 sps:$4 sm:$0xff]   ;;  %v4582_v30 = vld [vmem:[#allocation2 + $0x2c8] ss:$16 sps:$4 sm:$0xff]  }
  0x80   :  { %1428 = vmatprep.subr.bf16.mxu1 %v4502_v31  ;;  %v4585_v31 = vld [vmem:[#allocation2 + $0x4c8] ss:$16 sps:$4 sm:$0xff]  }
  0x82   :  { %1388 = vmatpush1.bf16.msra.mxu0 %v4497_v32  ;;  %v4590_v32 = vld [vmem:[#allocation2 + $0x2ac] ss:$16 sps:$4 sm:$0xff]  }
  0x83   :  { %1429 = vmatpush1.bf16.msra.mxu1 %v4500_v33  ;;  %1389 = vmatprep.subr.bf16.mxu0 %v4505_v34  ;;  %v4593_v33 = vld [vmem:[#allocation2 + $0x4ac] ss:$16 sps:$4 sm:$0xff]   ;;  %v4588_v34 = vld [vmem:[#allocation2 + $0x2a8] ss:$16 sps:$4 sm:$0xff]  }
  0x84   :  { %1430 = vmatprep.subr.bf16.mxu1 %v4508_v35  ;;  %v4591_v35 = vld [vmem:[#allocation2 + $0x4a8] ss:$16 sps:$4 sm:$0xff]  }
  0x86   :  { %1390 = vmatpush1.bf16.msra.mxu0 %v4503_v36  ;;  %v4596_v36 = vld [vmem:[#allocation2 + $0x28c] ss:$16 sps:$4 sm:$0xff]  }
  0x87   :  { %1431 = vmatpush1.bf16.msra.mxu1 %v4506_v37  ;;  %1391 = vmatprep.subr.bf16.mxu0 %v4511_v38  ;;  %v4599_v37 = vld [vmem:[#allocation2 + $0x48c] ss:$16 sps:$4 sm:$0xff]   ;;  %v4594_v38 = vld [vmem:[#allocation2 + $0x288] ss:$16 sps:$4 sm:$0xff]  }
  0x88   :  { %1432 = vmatprep.subr.bf16.mxu1 %v4514_v39  ;;  %v4602_v39 = vld [vmem:[#allocation2 + $0x26c] ss:$16 sps:$4 sm:$0xff]  }
  0x8a   :  { %1392 = vmatpush1.bf16.msra.mxu0 %v4509_v40  ;;  %v4605_v40 = vld [vmem:[#allocation2 + $0x46c] ss:$16 sps:$4 sm:$0xff]  }
  0x8b   :  { %1433 = vmatpush1.bf16.msra.mxu1 %v4512_v41  ;;  %1393 = vmatprep.subr.bf16.mxu0 %v4517_v42  ;;  %v4600_v41 = vld [vmem:[#allocation2 + $0x268] ss:$16 sps:$4 sm:$0xff]  }
  0x8c   :  { %1434 = vmatprep.subr.bf16.mxu1 %v4520_v44  ;;  %v4603_v42 = vld [vmem:[#allocation2 + $0x468] ss:$16 sps:$4 sm:$0xff]   ;;  %v4608_v44 = vld [vmem:[#allocation2 + $0x24c] ss:$16 sps:$4 sm:$0xff]  }
  0x8e   :  { %1394 = vmatpush1.bf16.msra.mxu0 %v4515_v45  ;;  %v4609_v45 = vld [vmem:[#allocation2 + $0x448] ss:$16 sps:$4 sm:$0xff]  }
  0x8f   :  { %1435 = vmatpush1.bf16.msra.mxu1 %v4518_v46  ;;  %1395 = vmatprep.subr.bf16.mxu0 %v4523_v47  ;;  %v4614_v46 = vld [vmem:[#allocation2 + $0x22c] ss:$16 sps:$4 sm:$0xff]  }
  0x90   :  { %1436 = vmatprep.subr.bf16.mxu1 %v4526_v48  ;;  %v4617_v47 = vld [vmem:[#allocation2 + $0x42c] ss:$16 sps:$4 sm:$0xff]   ;;  %v4612_v48 = vld [vmem:[#allocation2 + $0x228] ss:$16 sps:$4 sm:$0xff]  }
  0x92   :  { %1396 = vmatpush1.bf16.msra.mxu0 %v4521_v49  ;;  %v4615_v49 = vld [vmem:[#allocation2 + $0x428] ss:$16 sps:$4 sm:$0xff]  }
  0x93   :  { %1437 = vmatpush1.bf16.msra.mxu1 %v4524_v50  ;;  %1397 = vmatprep.subr.bf16.mxu0 %v4529_v51  ;;  %v4620_v50 = vld [vmem:[#allocation2 + $0x20c] ss:$16 sps:$4 sm:$0xff]  }
  0x94   :  { %1438 = vmatprep.subr.bf16.mxu1 %v4532_v52  ;;  %v4623_v51 = vld [vmem:[#allocation2 + $0x40c] ss:$16 sps:$4 sm:$0xff]   ;;  %v4618_v52 = vld [vmem:[#allocation2 + $0x208] ss:$16 sps:$4 sm:$0xff]  }
  0x96   :  { %1398 = vmatpush2.bf16.msra.mxu0 %v4527_v53  ;;  %v4621_v53 = vld [vmem:[#allocation2 + $0x408] ss:$16 sps:$4 sm:$0xff]  }
  0x97   :  { %1439 = vmatpush2.bf16.msra.mxu1 %v4530_v54  ;;  %1399 = vmatprep.subr.bf16.mxu0 %v4535_v55  ;;  %v4626_v54 = vld [vmem:[#allocation2 + $0x3ec] ss:$16 sps:$4 sm:$0xff]  }
  0x98   :  { %1440 = vmatprep.subr.bf16.mxu1 %v4538_v56  ;;  %v4629_v55 = vld [vmem:[#allocation2 + $0x5ec] ss:$16 sps:$4 sm:$0xff]   ;;  %v4624_v56 = vld [vmem:[#allocation2 + $0x3e8] ss:$16 sps:$4 sm:$0xff]  }
  0x9a   :  { %1400 = vmatpush2.bf16.msra.mxu0 %v4533_v57  ;;  %v4627_v57 = vld [vmem:[#allocation2 + $0x5e8] ss:$16 sps:$4 sm:$0xff]  }
  0x9b   :  { %1441 = vmatpush2.bf16.msra.mxu1 %v4536_v58  ;;  %1401 = vmatprep.subr.bf16.mxu0 %v4541_v59  ;;  %v4632_v58 = vld [vmem:[#allocation2 + $0x3cc] ss:$16 sps:$4 sm:$0xff]  }
  0x9c   :  { %1442 = vmatprep.subr.bf16.mxu1 %v4544_v60  ;;  %v4635_v59 = vld [vmem:[#allocation2 + $0x5cc] ss:$16 sps:$4 sm:$0xff]   ;;  %v4630_v60 = vld [vmem:[#allocation2 + $0x3c8] ss:$16 sps:$4 sm:$0xff]  }
  0x9e   :  { %1402 = vmatpush2.bf16.msra.mxu0 %v4539_v61  ;;  %v4633_v61 = vld [vmem:[#allocation2 + $0x5c8] ss:$16 sps:$4 sm:$0xff]  }
  0x9f   :  { %1443 = vmatpush2.bf16.msra.mxu1 %v4542_v62  ;;  %1403 = vmatprep.subr.bf16.mxu0 %v4547_v0  ;;  %v4638_v62 = vld [vmem:[#allocation2 + $0x3ac] ss:$16 sps:$4 sm:$0xff]  }
  0xa0   :  { %1444 = vmatprep.subr.bf16.mxu1 %v4550_v1  ;;  %v4641_v0 = vld [vmem:[#allocation2 + $0x5ac] ss:$16 sps:$4 sm:$0xff]   ;;  %v4636_v1 = vld [vmem:[#allocation2 + $0x3a8] ss:$16 sps:$4 sm:$0xff]  }
  0xa2   :  { %1404 = vmatpush2.bf16.msra.mxu0 %v4545_v2  ;;  %v4639_v2 = vld [vmem:[#allocation2 + $0x5a8] ss:$16 sps:$4 sm:$0xff]  }
  0xa3   :  { %1445 = vmatpush2.bf16.msra.mxu1 %v4548_v4  ;;  %1405 = vmatprep.subr.bf16.mxu0 %v4553_v5  ;;  %v4644_v4 = vld [vmem:[#allocation2 + $0x38c] ss:$16 sps:$4 sm:$0xff]  }
  0xa4   :  { %1446 = vmatprep.subr.bf16.mxu1 %v4556_v6  ;;  %v4647_v5 = vld [vmem:[#allocation2 + $0x58c] ss:$16 sps:$4 sm:$0xff]   ;;  %v4642_v6 = vld [vmem:[#allocation2 + $0x388] ss:$16 sps:$4 sm:$0xff]  }
  0xa6   :  { %1406 = vmatpush2.bf16.msra.mxu0 %v4551_v7  ;;  %v4645_v7 = vld [vmem:[#allocation2 + $0x588] ss:$16 sps:$4 sm:$0xff]  }
  0xa7   :  { %1447 = vmatpush2.bf16.msra.mxu1 %v4554_v8  ;;  %1407 = vmatprep.subr.bf16.mxu0 %v4559_v9  ;;  %v4650_v8 = vld [vmem:[#allocation2 + $0x36c] ss:$16 sps:$4 sm:$0xff]  }
  0xa8   :  { %1448 = vmatprep.subr.bf16.mxu1 %v4562_v10  ;;  %v4653_v9 = vld [vmem:[#allocation2 + $0x56c] ss:$16 sps:$4 sm:$0xff]   ;;  %v4648_v10 = vld [vmem:[#allocation2 + $0x368] ss:$16 sps:$4 sm:$0xff]  }
  0xaa   :  { %1408 = vmatpush2.bf16.msra.mxu0 %v4557_v11  ;;  %v4651_v11 = vld [vmem:[#allocation2 + $0x568] ss:$16 sps:$4 sm:$0xff]  }
  0xab   :  { %1449 = vmatpush2.bf16.msra.mxu1 %v4560_v12  ;;  %1409 = vmatprep.subr.bf16.mxu0 %v4565_v14  ;;  %v4656_v12 = vld [vmem:[#allocation2 + $0x34c] ss:$16 sps:$4 sm:$0xff]  }
  0xac   :  { %1450 = vmatprep.subr.bf16.mxu1 %v4568_v15  ;;  %v4659_v14 = vld [vmem:[#allocation2 + $0x54c] ss:$16 sps:$4 sm:$0xff]   ;;  %v4654_v15 = vld [vmem:[#allocation2 + $0x348] ss:$16 sps:$4 sm:$0xff]  }
  0xae   :  { %1410 = vmatpush2.bf16.msra.mxu0 %v4563_v16  ;;  %v4657_v16 = vld [vmem:[#allocation2 + $0x548] ss:$16 sps:$4 sm:$0xff]  }
  0xaf   :  { %1451 = vmatpush2.bf16.msra.mxu1 %v4566_v17  ;;  %1411 = vmatprep.subr.bf16.mxu0 %v4571_v19  ;;  %v4662_v17 = vld [vmem:[#allocation2 + $0x32c] ss:$16 sps:$4 sm:$0xff]  }
  0xb0   :  { %1452 = vmatprep.subr.bf16.mxu1 %v4574_v20  ;;  %v4665_v19 = vld [vmem:[#allocation2 + $0x52c] ss:$16 sps:$4 sm:$0xff]   ;;  %v4660_v20 = vld [vmem:[#allocation2 + $0x328] ss:$16 sps:$4 sm:$0xff]  }
  0xb2   :  { %1412 = vmatpush2.bf16.msra.mxu0 %v4569_v21  ;;  %v4663_v21 = vld [vmem:[#allocation2 + $0x528] ss:$16 sps:$4 sm:$0xff]  }
  0xb3   :  { %1453 = vmatpush2.bf16.msra.mxu1 %v4572_v22  ;;  %1463 = vmatprep.subr.bf16.mxu0 %v4578_v24  ;;  %v4668_v22 = vld [vmem:[#allocation2 + $0x30c] ss:$16 sps:$4 sm:$0xff]  }
  0xb4   :  { %1504 = vmatprep.subr.bf16.mxu1 %v4581_v25  ;;  %v4671_v24 = vld [vmem:[#allocation2 + $0x50c] ss:$16 sps:$4 sm:$0xff]   ;;  %v4666_v25 = vld [vmem:[#allocation2 + $0x308] ss:$16 sps:$4 sm:$0xff]  }
  0xb5   :  { %1414 = vmatmul.mubr.bf16.vlgmr.msra.gmra.mxu0 %v5185_v63 }
  0xb6   :  { %1455 = vmatmul.mubr.bf16.vlgmr.msra.gmra.mxu1 %v5191_v13  ;;  %1464 = vmatpush1.bf16.msra.mxu0 %v4576_v26  ;;  %v4597_v13 = vld [vmem:[#allocation2 + $0x488] ss:$16 sps:$4 sm:$0xff]  }
  0xb7   :  { %1505 = vmatpush1.bf16.msra.mxu1 %v4579_v27  ;;  %1465 = vmatprep.subr.bf16.mxu0 %v4584_v28  ;;  %v4669_v26 = vld [vmem:[#allocation2 + $0x508] ss:$16 sps:$4 sm:$0xff]   ;;  %v1747_v28 = vld [vmem:[#allocation4 + $0xf0] sm:$0xff] }
  0xb8   :  { %1506 = vmatprep.subr.bf16.mxu1 %v4587_v29  ;;  %1495 = vmatprep.mubr.bf16.mxu0 %v5187_v3  ;;  %v4611_v3 = vld [vmem:[#allocation2 + $0x44c] ss:$16 sps:$4 sm:$0xff]  }
  0xb9   :  { %1536 = vmatprep.mubr.bf16.mxu1 %v5198_v23  ;;  %v4606_v23 = vld [vmem:[#allocation2 + $0x248] ss:$16 sps:$4 sm:$0xff]  }
  0xba   :  { %1466 = vmatpush1.bf16.msra.mxu0 %v4582_v30  ;;  %v1748_v27 = vld [vmem:[#allocation4 + $0xf8] sm:$0xff]  ;;  %v1746_v29 = vld [vmem:[#allocation4 + $0xe8] sm:$0xff]  ;;  %v1745_v30 = vld [vmem:[#allocation4 + $0xe0] sm:$0xff] }
  0xbb   :  { %1507 = vmatpush1.bf16.msra.mxu1 %v4585_v31  ;;  %1467 = vmatprep.subr.bf16.mxu0 %v4590_v32  ;;  %v1744_v31 = vld [vmem:[#allocation4 + $0xd8] sm:$0xff]  ;;  %v1743_v32 = vld [vmem:[#allocation4 + $0xd0] sm:$0xff] }
  0xbc   :  { %1508 = vmatprep.subr.bf16.mxu1 %v4593_v33  ;;  %v1742_v33 = vld [vmem:[#allocation4 + $0xc8] sm:$0xff] }
  0xbe   :  { %1468 = vmatpush1.bf16.msra.mxu0 %v4588_v34  ;;  %v1741_v34 = vld [vmem:[#allocation4 + $0xc0] sm:$0xff] }
  0xbf   :  { %1509 = vmatpush1.bf16.msra.mxu1 %v4591_v35  ;;  %1469 = vmatprep.subr.bf16.mxu0 %v4596_v36  ;;  %v1740_v35 = vld [vmem:[#allocation4 + $0xb8] sm:$0xff]  ;;  %v1739_v36 = vld [vmem:[#allocation4 + $0xb0] sm:$0xff] }
  0xc0   :  { %1510 = vmatprep.subr.bf16.mxu1 %v4599_v37  ;;  %v1738_v37 = vld [vmem:[#allocation4 + $0xa8] sm:$0xff] }
  0xc2   :  { %1470 = vmatpush1.bf16.msra.mxu0 %v4594_v38  ;;  %v1737_v38 = vld [vmem:[#allocation4 + $0xa0] sm:$0xff] }
  0xc3   :  { %1511 = vmatpush1.bf16.msra.mxu1 %v4597_v13  ;;  %1471 = vmatprep.subr.bf16.mxu0 %v4602_v39  ;;  %v1734_v13 = vld [vmem:[#allocation4 + $0x88] sm:$0xff]  ;;  %v1733_v39 = vld [vmem:[#allocation4 + $0x80] sm:$0xff] }
  0xc4   :  { %1512 = vmatprep.subr.bf16.mxu1 %v4605_v40  ;;  %v1732_v40 = vld [vmem:[#allocation4 + $0x78] sm:$0xff] }
  0xc6   :  { %1472 = vmatpush1.bf16.msra.mxu0 %v4600_v41  ;;  %v1731_v41 = vld [vmem:[#allocation4 + $0x70] sm:$0xff] }
  0xc7   :  { %1513 = vmatpush1.bf16.msra.mxu1 %v4603_v42  ;;  %1473 = vmatprep.subr.bf16.mxu0 %v4608_v44  ;;  %v1730_v42 = vld [vmem:[#allocation4 + $0x68] sm:$0xff]  ;;  %v1729_v44 = vld [vmem:[#allocation4 + $0x60] sm:$0xff] }
  0xc8   :  { %1514 = vmatprep.subr.bf16.mxu1 %v4611_v3  ;;  %v1728_v3 = vld [vmem:[#allocation4 + $0x58] sm:$0xff] }
  0xca   :  { %1474 = vmatpush1.bf16.msra.mxu0 %v4606_v23  ;;  %v1727_v23 = vld [vmem:[#allocation4 + $0x50] sm:$0xff] }
  0xcb   :  { %1515 = vmatpush1.bf16.msra.mxu1 %v4609_v45  ;;  %1475 = vmatprep.subr.bf16.mxu0 %v4614_v46  ;;  %v1726_v45 = vld [vmem:[#allocation4 + $0x48] sm:$0xff]  ;;  %v1725_v46 = vld [vmem:[#allocation4 + $0x40] sm:$0xff] }
  0xcc   :  { %1516 = vmatprep.subr.bf16.mxu1 %v4617_v47  ;;  %v1724_v47 = vld [vmem:[#allocation4 + $0x38] sm:$0xff] }
  0xce   :  { %1476 = vmatpush1.bf16.msra.mxu0 %v4612_v48  ;;  %v1723_v48 = vld [vmem:[#allocation4 + $0x30] sm:$0xff] }
  0xcf   :  { %1517 = vmatpush1.bf16.msra.mxu1 %v4615_v49  ;;  %1477 = vmatprep.subr.bf16.mxu0 %v4620_v50  ;;  %v1722_v49 = vld [vmem:[#allocation4 + $0x28] sm:$0xff]  ;;  %v1721_v50 = vld [vmem:[#allocation4 + $0x20] sm:$0xff] }
  0xd0   :  { %1518 = vmatprep.subr.bf16.mxu1 %v4623_v51  ;;  %v1720_v51 = vld [vmem:[#allocation4 + $0x18] sm:$0xff] }
  0xd2   :  { %1478 = vmatpush1.bf16.msra.mxu0 %v4618_v52  ;;  %v1719_v52 = vld [vmem:[#allocation4 + $0x10] sm:$0xff] }
  0xd3   :  { %1519 = vmatpush1.bf16.msra.mxu1 %v4621_v53  ;;  %1479 = vmatprep.subr.bf16.mxu0 %v4626_v54  ;;  %v1718_v53 = vld [vmem:[#allocation4 + $0x8] sm:$0xff]  ;;  %v1717_v54 = vld [vmem:[#allocation4] sm:$0xff] }
  0xd4   :  { %1520 = vmatprep.subr.bf16.mxu1 %v4629_v55  ;;  %v1780_v55 = vld [vmem:[#allocation4 + $0x1f8] sm:$0xff] }
  0xd6   :  { %1480 = vmatpush2.bf16.msra.mxu0 %v4624_v56  ;;  %v1779_v56 = vld [vmem:[#allocation4 + $0x1f0] sm:$0xff] }
  0xd7   :  { %1521 = vmatpush2.bf16.msra.mxu1 %v4627_v57  ;;  %1481 = vmatprep.subr.bf16.mxu0 %v4632_v58  ;;  %v1778_v57 = vld [vmem:[#allocation4 + $0x1e8] sm:$0xff]  ;;  %v1777_v58 = vld [vmem:[#allocation4 + $0x1e0] sm:$0xff] }
  0xd8   :  { %1522 = vmatprep.subr.bf16.mxu1 %v4635_v59  ;;  %v1776_v59 = vld [vmem:[#allocation4 + $0x1d8] sm:$0xff] }
  0xda   :  { %1482 = vmatpush2.bf16.msra.mxu0 %v4630_v60  ;;  %v1775_v60 = vld [vmem:[#allocation4 + $0x1d0] sm:$0xff] }
  0xdb   :  { %1523 = vmatpush2.bf16.msra.mxu1 %v4633_v61  ;;  %1483 = vmatprep.subr.bf16.mxu0 %v4638_v62  ;;  %v1774_v61 = vld [vmem:[#allocation4 + $0x1c8] sm:$0xff]  ;;  %v1773_v62 = vld [vmem:[#allocation4 + $0x1c0] sm:$0xff] }
  0xdc   :  { %1524 = vmatprep.subr.bf16.mxu1 %v4641_v0  ;;  %v1772_v0 = vld [vmem:[#allocation4 + $0x1b8] sm:$0xff] }
  0xde   :  { %1484 = vmatpush2.bf16.msra.mxu0 %v4636_v1  ;;  %v1771_v1 = vld [vmem:[#allocation4 + $0x1b0] sm:$0xff] }
  0xdf   :  { %1525 = vmatpush2.bf16.msra.mxu1 %v4639_v2  ;;  %1485 = vmatprep.subr.bf16.mxu0 %v4644_v4  ;;  %v1770_v2 = vld [vmem:[#allocation4 + $0x1a8] sm:$0xff]  ;;  %v1769_v4 = vld [vmem:[#allocation4 + $0x1a0] sm:$0xff] }
  0xe0   :  { %1526 = vmatprep.subr.bf16.mxu1 %v4647_v5  ;;  %v1768_v5 = vld [vmem:[#allocation4 + $0x198] sm:$0xff] }
  0xe2   :  { %1486 = vmatpush2.bf16.msra.mxu0 %v4642_v6  ;;  %v1767_v6 = vld [vmem:[#allocation4 + $0x190] sm:$0xff] }
  0xe3   :  { %1527 = vmatpush2.bf16.msra.mxu1 %v4645_v7  ;;  %1487 = vmatprep.subr.bf16.mxu0 %v4650_v8  ;;  %v1766_v7 = vld [vmem:[#allocation4 + $0x188] sm:$0xff]  ;;  %v1765_v8 = vld [vmem:[#allocation4 + $0x180] sm:$0xff] }
  0xe4   :  { %1528 = vmatprep.subr.bf16.mxu1 %v4653_v9  ;;  %v1764_v9 = vld [vmem:[#allocation4 + $0x178] sm:$0xff] }
  0xe6   :  { %1488 = vmatpush2.bf16.msra.mxu0 %v4648_v10  ;;  %v1763_v10 = vld [vmem:[#allocation4 + $0x170] sm:$0xff] }
  0xe7   :  { %1529 = vmatpush2.bf16.msra.mxu1 %v4651_v11  ;;  %1489 = vmatprep.subr.bf16.mxu0 %v4656_v12  ;;  %v1762_v11 = vld [vmem:[#allocation4 + $0x168] sm:$0xff]  ;;  %v1761_v12 = vld [vmem:[#allocation4 + $0x160] sm:$0xff] }
  0xe8   :  { %1530 = vmatprep.subr.bf16.mxu1 %v4659_v14  ;;  %v1760_v14 = vld [vmem:[#allocation4 + $0x158] sm:$0xff] }
  0xea   :  { %1490 = vmatpush2.bf16.msra.mxu0 %v4654_v15  ;;  %v1759_v15 = vld [vmem:[#allocation4 + $0x150] sm:$0xff] }
  0xeb   :  { %1531 = vmatpush2.bf16.msra.mxu1 %v4657_v16  ;;  %1491 = vmatprep.subr.bf16.mxu0 %v4662_v17  ;;  %v1758_v16 = vld [vmem:[#allocation4 + $0x148] sm:$0xff]  ;;  %v1757_v17 = vld [vmem:[#allocation4 + $0x140] sm:$0xff] }
  0xec   :  { %1532 = vmatprep.subr.bf16.mxu1 %v4665_v19  ;;  %v1756_v19 = vld [vmem:[#allocation4 + $0x138] sm:$0xff] }
  0xee   :  { %1492 = vmatpush2.bf16.msra.mxu0 %v4660_v20  ;;  %v1755_v20 = vld [vmem:[#allocation4 + $0x130] sm:$0xff] }
  0xef   :  { %1533 = vmatpush2.bf16.msra.mxu1 %v4663_v21  ;;  %1493 = vmatprep.subr.bf16.mxu0 %v4668_v22  ;;  %v1754_v21 = vld [vmem:[#allocation4 + $0x128] sm:$0xff]  ;;  %v1753_v22 = vld [vmem:[#allocation4 + $0x120] sm:$0xff] }
  0xf0   :  { %1534 = vmatprep.subr.bf16.mxu1 %v4671_v24  ;;  %v1752_v24 = vld [vmem:[#allocation4 + $0x118] sm:$0xff] }
  0xf2   :  { %1494 = vmatpush2.bf16.msra.mxu0 %v4666_v25  ;;  %v1751_v25 = vld [vmem:[#allocation4 + $0x110] sm:$0xff] }
  0xf3   :  { %1535 = vmatpush2.bf16.msra.mxu1 %v4669_v26  ;;  %1845 = vmatprep.subr.mxu0 %v1748_v27  ;;  %v1750_v26 = vld [vmem:[#allocation4 + $0x108] sm:$0xff]  ;;  %v1749_v27 = vld [vmem:[#allocation4 + $0x100] sm:$0xff] }
  0xf5   :  { %1496 = vmatmul.mubr.bf16.vlgmr.msra.gmra.mxu0 %v5195_v18  ;;  %v1736_v18 = vld [vmem:[#allocation4 + $0x98] sm:$0xff] }
  0xf6   :  { %1537 = vmatmul.mubr.bf16.vlgmr.msra.gmra.mxu1 %v5185_v63  ;;  %1846 = vmatpush1.msra.mxu0 %v1747_v28  ;;  %v1735_v63 = vld [vmem:[#allocation4 + $0x90] sm:$0xff]  ;;  %v1812_v28 = vld [vmem:[#allocation4 + $0x2f8] sm:$0xff] }
  0xf7   :  { %1847 = vmatprep.subr.mxu0 %v1746_v29  ;;  %1916 = vmatprep.subr.mxu1 %v1812_v28  ;;  %v1822_v28 = vld [vmem:[#allocation4 + $0x348] sm:$0xff] }
  0xf8   :  { %1848 = vmatpush1.msra.mxu0 %v1745_v30 }
  0xf9   :  { %1849 = vmatprep.subr.mxu0 %v1744_v31  ;;  %v1811_v31 = vld [vmem:[#allocation4 + $0x2f0] sm:$0xff] }
  0xfa   :  { %1850 = vmatpush1.msra.mxu0 %v1743_v32  ;;  %1917 = vmatpush1.msra.mxu1 %v1811_v31  ;;  %v1819_v31 = vld [vmem:[#allocation4 + $0x330] sm:$0xff] }
  0xfb   :  { %1851 = vmatprep.subr.mxu0 %v1742_v33  ;;  %v1810_v33 = vld [vmem:[#allocation4 + $0x2e8] sm:$0xff] }
  0xfc   :  { %1852 = vmatpush1.msra.mxu0 %v1741_v34  ;;  %1918 = vmatprep.subr.mxu1 %v1810_v33  ;;  %v1818_v33 = vld [vmem:[#allocation4 + $0x328] sm:$0xff] }
  0xfd   :  { %1853 = vmatprep.subr.mxu0 %v1740_v35 }
  0xfe   :  { %1854 = vmatpush1.msra.mxu0 %v1739_v36  ;;  %v1809_v36 = vld [vmem:[#allocation4 + $0x2e0] sm:$0xff] }
  0xff   :  { %1855 = vmatprep.subr.mxu0 %v1738_v37  ;;  %1919 = vmatpush1.msra.mxu1 %v1809_v36  ;;  %v1808_v37 = vld [vmem:[#allocation4 + $0x2d8] sm:$0xff]  ;;  %v1817_v36 = vld [vmem:[#allocation4 + $0x320] sm:$0xff] }
 0x100   :  { %1856 = vmatpush1.msra.mxu0 %v1737_v38  ;;  %1920 = vmatprep.subr.mxu1 %v1808_v37  ;;  %v1816_v37 = vld [vmem:[#allocation4 + $0x318] sm:$0xff] }
 0x101   :  { %1857 = vmatprep.subr.mxu0 %v1736_v18 }
 0x102   :  { %1858 = vmatpush1.msra.mxu0 %v1735_v63  ;;  %v1807_v63 = vld [vmem:[#allocation4 + $0x2d0] sm:$0xff] }
 0x103   :  { %1859 = vmatprep.subr.mxu0 %v1734_v13  ;;  %1921 = vmatpush1.msra.mxu1 %v1807_v63  ;;  %v1806_v13 = vld [vmem:[#allocation4 + $0x2c8] sm:$0xff]  ;;  %v1813_v63 = vld [vmem:[#allocation4 + $0x300] sm:$0xff] }
 0x104   :  { %1860 = vmatpush1.msra.mxu0 %v1733_v39  ;;  %1922 = vmatprep.subr.mxu1 %v1806_v13 }
 0x105   :  { %1861 = vmatprep.subr.mxu0 %v1732_v40 }
 0x106   :  { %1862 = vmatpush1.msra.mxu0 %v1731_v41  ;;  %v1805_v41 = vld [vmem:[#allocation4 + $0x2c0] sm:$0xff] }
 0x107   :  { %1863 = vmatprep.subr.mxu0 %v1730_v42  ;;  %1923 = vmatpush1.msra.mxu1 %v1805_v41  ;;  %v1804_v42 = vld [vmem:[#allocation4 + $0x2b8] sm:$0xff] }
 0x108   :  { %1864 = vmatpush1.msra.mxu0 %v1729_v44  ;;  %1924 = vmatprep.subr.mxu1 %v1804_v42  ;;  %v1803_v44 = vld [vmem:[#allocation4 + $0x2b0] sm:$0xff] }
 0x109   :  { %1865 = vmatprep.subr.mxu0 %v1728_v3  ;;  %1925 = vmatpush1.msra.mxu1 %v1803_v44  ;;  %v1802_v3 = vld [vmem:[#allocation4 + $0x2a8] sm:$0xff] }
 0x10a   :  { %1866 = vmatpush1.msra.mxu0 %v1727_v23  ;;  %1926 = vmatprep.subr.mxu1 %v1802_v3  ;;  %v1801_v23 = vld [vmem:[#allocation4 + $0x2a0] sm:$0xff] }
 0x10b   :  { %1867 = vmatprep.subr.mxu0 %v1726_v45  ;;  %1927 = vmatpush1.msra.mxu1 %v1801_v23  ;;  %v1800_v45 = vld [vmem:[#allocation4 + $0x298] sm:$0xff] }
 0x10c   :  { %1868 = vmatpush1.msra.mxu0 %v1725_v46  ;;  %1928 = vmatprep.subr.mxu1 %v1800_v45  ;;  %v1799_v46 = vld [vmem:[#allocation4 + $0x290] sm:$0xff] }
 0x10d   :  { %1869 = vmatprep.subr.mxu0 %v1724_v47  ;;  %1929 = vmatpush1.msra.mxu1 %v1799_v46  ;;  %v1798_v47 = vld [vmem:[#allocation4 + $0x288] sm:$0xff] }
 0x10e   :  { %1870 = vmatpush1.msra.mxu0 %v1723_v48  ;;  %1930 = vmatprep.subr.mxu1 %v1798_v47  ;;  %v1797_v48 = vld [vmem:[#allocation4 + $0x280] sm:$0xff] }
 0x10f   :  { %1871 = vmatprep.subr.mxu0 %v1722_v49  ;;  %1931 = vmatpush1.msra.mxu1 %v1797_v48  ;;  %v1796_v49 = vld [vmem:[#allocation4 + $0x278] sm:$0xff] }
 0x110   :  { %1872 = vmatpush1.msra.mxu0 %v1721_v50  ;;  %1932 = vmatprep.subr.mxu1 %v1796_v49  ;;  %v1795_v50 = vld [vmem:[#allocation4 + $0x270] sm:$0xff] }
 0x111   :  { %1873 = vmatprep.subr.mxu0 %v1720_v51  ;;  %1933 = vmatpush1.msra.mxu1 %v1795_v50  ;;  %v1794_v51 = vld [vmem:[#allocation4 + $0x268] sm:$0xff] }
 0x112   :  { %1874 = vmatpush1.msra.mxu0 %v1719_v52  ;;  %1934 = vmatprep.subr.mxu1 %v1794_v51  ;;  %v1793_v52 = vld [vmem:[#allocation4 + $0x260] sm:$0xff] }
 0x113   :  { %1875 = vmatprep.subr.mxu0 %v1718_v53  ;;  %1935 = vmatpush1.msra.mxu1 %v1793_v52  ;;  %v1792_v53 = vld [vmem:[#allocation4 + $0x258] sm:$0xff] }
 0x114   :  { %1876 = vmatpush1.msra.mxu0 %v1717_v54  ;;  %1936 = vmatprep.subr.mxu1 %v1792_v53  ;;  %v1791_v54 = vld [vmem:[#allocation4 + $0x250] sm:$0xff] }
 0x115   :  { %1877 = vmatprep.subr.mxu0 %v1780_v55  ;;  %1937 = vmatpush1.msra.mxu1 %v1791_v54  ;;  %v1790_v55 = vld [vmem:[#allocation4 + $0x248] sm:$0xff] }
 0x116   :  { %1878 = vmatpush2.msra.mxu0 %v1779_v56  ;;  %1938 = vmatprep.subr.mxu1 %v1790_v55  ;;  %v1789_v56 = vld [vmem:[#allocation4 + $0x240] sm:$0xff] }
 0x117   :  { %1879 = vmatprep.subr.mxu0 %v1778_v57  ;;  %1939 = vmatpush1.msra.mxu1 %v1789_v56  ;;  %v1788_v57 = vld [vmem:[#allocation4 + $0x238] sm:$0xff] }
 0x118   :  { %1880 = vmatpush2.msra.mxu0 %v1777_v58  ;;  %1940 = vmatprep.subr.mxu1 %v1788_v57  ;;  %v1787_v58 = vld [vmem:[#allocation4 + $0x230] sm:$0xff] }
 0x119   :  { %1881 = vmatprep.subr.mxu0 %v1776_v59  ;;  %1941 = vmatpush1.msra.mxu1 %v1787_v58  ;;  %v1786_v59 = vld [vmem:[#allocation4 + $0x228] sm:$0xff] }
 0x11a   :  { %1882 = vmatpush2.msra.mxu0 %v1775_v60  ;;  %1942 = vmatprep.subr.mxu1 %v1786_v59  ;;  %v1785_v60 = vld [vmem:[#allocation4 + $0x220] sm:$0xff] }
 0x11b   :  { %1883 = vmatprep.subr.mxu0 %v1774_v61  ;;  %1943 = vmatpush1.msra.mxu1 %v1785_v60  ;;  %v1784_v61 = vld [vmem:[#allocation4 + $0x218] sm:$0xff] }
 0x11c   :  { %1884 = vmatpush2.msra.mxu0 %v1773_v62  ;;  %1944 = vmatprep.subr.mxu1 %v1784_v61  ;;  %v1783_v62 = vld [vmem:[#allocation4 + $0x210] sm:$0xff] }
 0x11d   :  { %1885 = vmatprep.subr.mxu0 %v1772_v0  ;;  %1945 = vmatpush1.msra.mxu1 %v1783_v62  ;;  %v1782_v0 = vld [vmem:[#allocation4 + $0x208] sm:$0xff] }
 0x11e   :  { %1886 = vmatpush2.msra.mxu0 %v1771_v1  ;;  %1946 = vmatprep.subr.mxu1 %v1782_v0  ;;  %v1781_v1 = vld [vmem:[#allocation4 + $0x200] sm:$0xff] }
 0x11f   :  { %1887 = vmatprep.subr.mxu0 %v1770_v2  ;;  %1947 = vmatpush1.msra.mxu1 %v1781_v1  ;;  %v1844_v2 = vld [vmem:[#allocation4 + $0x3f8] sm:$0xff] }
 0x120   :  { %1888 = vmatpush2.msra.mxu0 %v1769_v4  ;;  %1948 = vmatprep.subr.mxu1 %v1844_v2  ;;  %v1843_v4 = vld [vmem:[#allocation4 + $0x3f0] sm:$0xff] }
 0x121   :  { %1889 = vmatprep.subr.mxu0 %v1768_v5  ;;  %1949 = vmatpush2.msra.mxu1 %v1843_v4  ;;  %v1842_v5 = vld [vmem:[#allocation4 + $0x3e8] sm:$0xff] }
 0x122   :  { %1890 = vmatpush2.msra.mxu0 %v1767_v6  ;;  %1950 = vmatprep.subr.mxu1 %v1842_v5  ;;  %v1841_v6 = vld [vmem:[#allocation4 + $0x3e0] sm:$0xff] }
 0x123   :  { %1891 = vmatprep.subr.mxu0 %v1766_v7  ;;  %1951 = vmatpush2.msra.mxu1 %v1841_v6  ;;  %v1840_v7 = vld [vmem:[#allocation4 + $0x3d8] sm:$0xff] }
 0x124   :  { %1892 = vmatpush2.msra.mxu0 %v1765_v8  ;;  %1952 = vmatprep.subr.mxu1 %v1840_v7  ;;  %v1839_v8 = vld [vmem:[#allocation4 + $0x3d0] sm:$0xff] }
 0x125   :  { %1893 = vmatprep.subr.mxu0 %v1764_v9  ;;  %1953 = vmatpush2.msra.mxu1 %v1839_v8  ;;  %v1838_v9 = vld [vmem:[#allocation4 + $0x3c8] sm:$0xff] }
 0x126   :  { %1894 = vmatpush2.msra.mxu0 %v1763_v10  ;;  %1954 = vmatprep.subr.mxu1 %v1838_v9  ;;  %v1837_v10 = vld [vmem:[#allocation4 + $0x3c0] sm:$0xff] }
 0x127   :  { %1895 = vmatprep.subr.mxu0 %v1762_v11  ;;  %1955 = vmatpush2.msra.mxu1 %v1837_v10  ;;  %v1836_v11 = vld [vmem:[#allocation4 + $0x3b8] sm:$0xff] }
 0x128   :  { %1896 = vmatpush2.msra.mxu0 %v1761_v12  ;;  %1956 = vmatprep.subr.mxu1 %v1836_v11  ;;  %v1835_v12 = vld [vmem:[#allocation4 + $0x3b0] sm:$0xff] }
 0x129   :  { %1897 = vmatprep.subr.mxu0 %v1760_v14  ;;  %1957 = vmatpush2.msra.mxu1 %v1835_v12  ;;  %v1834_v14 = vld [vmem:[#allocation4 + $0x3a8] sm:$0xff] }
 0x12a   :  { %1898 = vmatpush2.msra.mxu0 %v1759_v15  ;;  %1958 = vmatprep.subr.mxu1 %v1834_v14  ;;  %v1833_v15 = vld [vmem:[#allocation4 + $0x3a0] sm:$0xff] }
 0x12b   :  { %1899 = vmatprep.subr.mxu0 %v1758_v16  ;;  %1959 = vmatpush2.msra.mxu1 %v1833_v15  ;;  %v1832_v16 = vld [vmem:[#allocation4 + $0x398] sm:$0xff] }
 0x12c   :  { %1900 = vmatpush2.msra.mxu0 %v1757_v17  ;;  %1960 = vmatprep.subr.mxu1 %v1832_v16  ;;  %v1831_v17 = vld [vmem:[#allocation4 + $0x390] sm:$0xff] }
 0x12d   :  { %1901 = vmatprep.subr.mxu0 %v1756_v19  ;;  %1961 = vmatpush2.msra.mxu1 %v1831_v17  ;;  %v1830_v19 = vld [vmem:[#allocation4 + $0x388] sm:$0xff] }
 0x12e   :  { %1902 = vmatpush2.msra.mxu0 %v1755_v20  ;;  %1962 = vmatprep.subr.mxu1 %v1830_v19  ;;  %v1829_v20 = vld [vmem:[#allocation4 + $0x380] sm:$0xff] }
 0x12f   :  { %1903 = vmatprep.subr.mxu0 %v1754_v21  ;;  %1963 = vmatpush2.msra.mxu1 %v1829_v20  ;;  %v1828_v21 = vld [vmem:[#allocation4 + $0x378] sm:$0xff] }
 0x130   :  { %1904 = vmatpush2.msra.mxu0 %v1753_v22  ;;  %1964 = vmatprep.subr.mxu1 %v1828_v21  ;;  %v1827_v22 = vld [vmem:[#allocation4 + $0x370] sm:$0xff] }
 0x131   :  { %1905 = vmatprep.subr.mxu0 %v1752_v24  ;;  %1965 = vmatpush2.msra.mxu1 %v1827_v22  ;;  %v1826_v24 = vld [vmem:[#allocation4 + $0x368] sm:$0xff] }
 0x132   :  { %1906 = vmatpush2.msra.mxu0 %v1751_v25  ;;  %1966 = vmatprep.subr.mxu1 %v1826_v24  ;;  %v1825_v25 = vld [vmem:[#allocation4 + $0x360] sm:$0xff] }
 0x133   :  { %1907 = vmatprep.subr.mxu0 %v1750_v26  ;;  %1967 = vmatpush2.msra.mxu1 %v1825_v25  ;;  %v1824_v26 = vld [vmem:[#allocation4 + $0x358] sm:$0xff] }
 0x134   :  { %1908 = vmatpush2.msra.mxu0 %v1749_v27  ;;  %1968 = vmatprep.subr.mxu1 %v1824_v26  ;;  %v1823_v27 = vld [vmem:[#allocation4 + $0x350] sm:$0xff]  ;;  %v5227_v26 = vsub.s32 0, %v5173_v43 }
 0x135   :  { %v1333_v29 = vpop.f32.mrf.mxu0  ;;  %1969 = vmatpush2.msra.mxu1 %v1823_v27  ;;  %v89_v27 = vld [vmem:[%s5398_s6] sm:$0xff] }
 0x136   :  { %v1374_v30 = vpop.f32.mrf.mxu1  ;;  %1970 = vmatprep.subr.mxu1 %v1822_v28  ;;  %v5233_v28 = vsub.s32 4, %v5173_v43 }
 0x137   :  { %v5209_v32 = vadd.f32 %v1374_v30, %v1333_v29  ;;  %v5211_v34 = vpop.f32.mrf.mxu0  ;;  %v1821_v29 = vld [vmem:[#allocation4 + $0x340] sm:$0xff]  ;;  %v1820_v30 = vld [vmem:[#allocation4 + $0x338] sm:$0xff] }
 0x138   :  { %v5213_v35 = vpop.f32.mrf.mxu1  ;;  %1971 = vmatpush2.msra.mxu1 %v1821_v29  ;;  %v1628_v29 = vrot.slane %v89_v27, %v5227_v26 }
 0x139   :  { %v1337_v38 = vpop.f32.mrf.mxu0  ;;  %1972 = vmatprep.subr.mxu1 %v1820_v30  ;;  %v1632_v30 = vrot.slane %v89_v27, %v5233_v28 }
 0x13a   :  { %v1378_v18 = vpop.f32.mrf.mxu1  ;;  %1973 = vmatpush2.msra.mxu1 %v1819_v31  ;;  %v1815_v38 = vld [vmem:[#allocation4 + $0x310] sm:$0xff]  ;;  %v5238_v31 = vsub.s32 5, %v5173_v43 }
 0x13b   :  { %v1338_v39 = vpop.f32.mrf.mxu0  ;;  %1974 = vmatprep.subr.mxu1 %v1818_v33  ;;  %v1814_v18 = vld [vmem:[#allocation4 + $0x308] sm:$0xff]  ;;  %v5241_v33 = vsub.s32 1, %v5173_v43 }
 0x13c   :  { %v1379_v40 = vpop.f32.mrf.mxu1  ;;  %1975 = vmatpush2.msra.mxu1 %v1817_v36  ;;  %v1648_v36 = vrot.slane %v1628_v29, %v5227_v26 }
 0x13d   :  { %1976 = vmatprep.subr.mxu1 %v1816_v37  ;;  %v1377_v40 = vadd.f32 %v5213_v35, %v5211_v34  ;;  %v1652_v37 = vrot.slane %v1632_v30, %v5227_v26 }
 0x13e   :  { %1977 = vmatpush2.msra.mxu1 %v1815_v38  ;;  %v1684_v38 = vrot.slane %v89_v27, %v5238_v31 }
 0x13f   :  { %1978 = vmatprep.subr.mxu1 %v1814_v18  ;;  %v1680_v18 = vrot.slane %v89_v27, %v5241_v33 }
 0x140   :  { %1979 = vmatpush2.msra.mxu1 %v1813_v63 }
 0x175   :  { %v1415_v13 = vpop.f32.mrf.mxu0 }
 0x176   :  { %v5215_v39 = vpop.f32.mrf.mxu1  ;;  %v1416_v41 = vadd.f32 %v1415_v13, %v5209_v32 }
 0x177   :  { %v1417_v42 = vpop.f32.mrf.mxu0 }
 0x178   :  { %v5220_v44 = vpop.f32.mrf.mxu1  ;;  %v1545_v3 = vmax.f32 %v1416_v41, 0.0  ;;  %v1418_v23 = vadd.f32 %v1417_v42, %v1377_v40  ;;  %v1704_v41 = vrot.slane %v1684_v38, %v5241_v33 }
 0x179   :  { %v1419_v45 = vpop.f32.mrf.mxu0 }
 0x17a   :  { %v1460_v46 = vpop.f32.mrf.mxu1  ;;  %v1550_v47 = vsel %vm1549_vm0, %v1545_v3, 0.0  ;;  %v1546_v48 = vmax.f32 %v1418_v23, 0.0  ;;  %v1700_v23 = vrot.slane %v1680_v18, %v5241_v33 }
 0x17b   :  { %v1551_v49 = vrot.slane %v1550_v47, 4  ;;  %v1420_v50 = vpop.f32.mrf.mxu0 }
 0x17c   :  { %v1461_v51 = vpop.f32.mrf.mxu1  ;;  %v1557_v52 = vsel %vm1549_vm0, %v1546_v48, 0.0 }
 0x17d   :  { %v1552_v53 = vadd.f32 %v1551_v49, %v1550_v47  ;;  %v1558_v34 = vrot.slane %v1557_v52, 4 }
 0x17f   :  { %v1553_v35 = vrot.slane %v1552_v53, 2  ;;  %v1559_v32 = vadd.f32 %v1558_v34, %v1557_v52 }
 0x181   :  { %v1554_v54 = vadd.f32 %v1553_v35, %v1552_v53  ;;  %v1560_v55 = vrot.slane %v1559_v32, 2 }
 0x183   :  { %v1555_v56 = vrot.slane %v1554_v54, 1  ;;  %v1561_v57 = vadd.f32 %v1560_v55, %v1559_v32 }
 0x185   :  { %v1556_v58 = vadd.f32 %v1555_v56, %v1554_v54  ;;  %v1562_v59 = vrot.slane %v1561_v57, 1 }
 0x187   :  { %v1579_v60 = vmul.f32 0.5, %v1556_v58  ;;  %v1563_v61 = vadd.f32 %v1562_v59, %v1561_v57 }
 0x189   :  { %v1583_v62 = vsub.f32 %v1545_v3, %v1579_v60  ;;  %v1580_v0 = vmul.f32 0.5, %v1563_v61 }
 0x18b   :  { %v1587_v1 = vmul.f32 %v1583_v62, %v1583_v62  ;;  %v1584_v2 = vsub.f32 %v1546_v48, %v1580_v0  ;;  %v1661_v13 = vmul.f32 %v1648_v36, %v1583_v62 }
 0x18d   :  { %v1591_v4 = vsel %vm1549_vm0, %v1587_v1, 0.0  ;;  %v1588_v5 = vmul.f32 %v1584_v2, %v1584_v2  ;;  %v1662_v40 = vmul.f32 %v1652_v37, %v1584_v2 }
 0x18e   :  { %v1592_v6 = vrot.slane %v1591_v4, 4 }
 0x18f   :  { %v1598_v7 = vsel %vm1549_vm0, %v1588_v5, 0.0 }
 0x190   :  { %v1593_v8 = vadd.f32 %v1592_v6, %v1591_v4  ;;  %v1599_v9 = vrot.slane %v1598_v7, 4 }
 0x192   :  { %v1594_v10 = vrot.slane %v1593_v8, 2  ;;  %v1600_v11 = vadd.f32 %v1599_v9, %v1598_v7 }
 0x194   :  { %v1595_v12 = vadd.f32 %v1594_v10, %v1593_v8  ;;  %v1601_v14 = vrot.slane %v1600_v11, 2 }
 0x196   :  { %v1596_v15 = vrot.slane %v1595_v12, 1  ;;  %v1602_v16 = vadd.f32 %v1601_v14, %v1600_v11 }
 0x198   :  { %v1597_v17 = vadd.f32 %v1596_v15, %v1595_v12  ;;  %v1603_v19 = vrot.slane %v1602_v16, 1 }
 0x19a   :  { %v1619_v20 = vmul.f32 0.5, %v1597_v17  ;;  %v1604_v21 = vadd.f32 %v1603_v19, %v1602_v16 }
 0x19c   :  { %v1665_v22 = vadd.f32 1e-05, %v1619_v20  ;;  %v1620_v24 = vmul.f32 0.5, %v1604_v21 }
 0x19e   :  { %4960 = vrsqrt.f32 %v1665_v22  ;;  %v1666_v25 = vadd.f32 1e-05, %v1620_v24 }
 0x1a0   :  { %4962 = vrsqrt.f32 %v1666_v25 }
 0x1ab   :  { %v4961_v63 = vpop.eup %4960 }
 0x1ac   :  { %v1673_v3 = vmul.f32 %v4961_v63, %v1661_v13 }
 0x1ad   :  { %v4963_v42 = vpop.eup %4962 }
 0x1ae   :  { %v1674_v45 = vmul.f32 %v4963_v42, %v1662_v40  ;;  %v1713_v47 = vadd.f32 %v1700_v23, %v1673_v3 }
 0x1b0   :  { %v1714_v46 = vadd.f32 %v1704_v41, %v1674_v45  ;;  %v5258_v41 = vld [vmem:[%s5398_s6 + $0x8] sm:$0xff] }
 0x1b1   :  { %v1636_v42 = vrot.slane %v5258_v41, %v5227_v26  ;;  %v1640_v3 = vrot.slane %v5258_v41, %v5233_v28 }
 0x1b2   :  { %1909 = vmatprep.mubr.f32.mxu0 %v1714_v46  ;;  %v1692_v46 = vrot.slane %v5258_v41, %v5238_v31 }
 0x1b3   :  { %1910 = vmatmul.mubr.f32.vlgmr.msra.gmra.mxu0 %v1713_v47  ;;  %v1656_v23 = vrot.slane %v1636_v42, %v5227_v26  ;;  %v1660_v45 = vrot.slane %v1640_v3, %v5227_v26  ;;  %v1688_v47 = vrot.slane %v5258_v41, %v5241_v33  ;;  %v2108_v42 = vld [vmem:[#allocation6 + $0xa0] sm:$0xff]  ;;  %v2110_v3 = vld [vmem:[#allocation6 + $0xb0] sm:$0xff] }
 0x1b5   :  { %v1497_v48 = vpop.f32.mrf.mxu0 }
 0x1b6   :  { %v1538_v49 = vpop.f32.mrf.mxu1  ;;  %v1498_v50 = vadd.f32 %v1497_v48, %v5215_v39 }
 0x1b7   :  { %v1499_v51 = vpop.f32.mrf.mxu0 }
 0x1b8   :  { %v1540_v52 = vpop.f32.mrf.mxu1  ;;  %v1539_v53 = vadd.f32 %v1538_v49, %v1498_v50  ;;  %v1500_v34 = vadd.f32 %v1499_v51, %v5220_v44  ;;  %v1712_v51 = vrot.slane %v1692_v46, %v5241_v33  ;;  %v2104_v46 = vld [vmem:[#allocation6 + $0x80] sm:$0xff] }
 0x1b9   :  { %v1501_v35 = vpop.f32.mrf.mxu0 }
 0x1ba   :  { %v1542_v32 = vpop.f32.mrf.mxu1  ;;  %v1547_v54 = vmax.f32 %v1539_v53, 0.0  ;;  %v1541_v55 = vadd.f32 %v1540_v52, %v1500_v34  ;;  %v1708_v34 = vrot.slane %v1688_v47, %v5241_v33  ;;  %v2106_v47 = vld [vmem:[#allocation6 + $0x90] sm:$0xff] }
 0x1bb   :  { %v1502_v56 = vpop.f32.mrf.mxu0 }
 0x1bc   :  { %v1543_v57 = vpop.f32.mrf.mxu1  ;;  %v1564_v58 = vsel %vm1549_vm0, %v1547_v54, 0.0  ;;  %v1548_v59 = vmax.f32 %v1541_v55, 0.0  ;;  %v2149_v55 = vld [vmem:[#allocation6 + $0x1e8] sm:$0xff]  ;;  %v2151_v56 = vld [vmem:[#allocation6 + $0x1f8] sm:$0xff] }
 0x1bd   :  { %v1565_v60 = vrot.slane %v1564_v58, 4  ;;  %2152 = vmatprep.subr.mxu0 %v2149_v55  ;;  %2223 = vmatprep.subr.mxu1 %v2151_v56  ;;  %v2148_v57 = vld [vmem:[#allocation6 + $0x1e0] sm:$0xff]  ;;  %v2094_v56 = vld [vmem:[#allocation6 + $0x30] sm:$0xff] }
 0x1be   :  { %v1571_v61 = vsel %vm1549_vm0, %v1548_v59, 0.0  ;;  %2153 = vmatpush1.msra.mxu0 %v2148_v57  ;;  %v2092_v55 = vld [vmem:[#allocation6 + $0x20] sm:$0xff]  ;;  %v2089_v57 = vld [vmem:[#allocation6 + $0x8] sm:$0xff] }
 0x1bf   :  { %v1566_v62 = vadd.f32 %v1565_v60, %v1564_v58  ;;  %v1572_v0 = vrot.slane %v1571_v61, 4  ;;  %v2150_v58 = vld [vmem:[#allocation6 + $0x1f0] sm:$0xff]  ;;  %v2147_v60 = vld [vmem:[#allocation6 + $0x1d8] sm:$0xff] }
 0x1c1   :  { %v1567_v39 = vrot.slane %v1566_v62, 2  ;;  %v1573_v1 = vadd.f32 %v1572_v0, %v1571_v61  ;;  %v2144_v61 = vld [vmem:[#allocation6 + $0x1c0] sm:$0xff]  ;;  %v2141_v0 = vld [vmem:[#allocation6 + $0x1a8] sm:$0xff] }
 0x1c3   :  { %v1568_v2 = vadd.f32 %v1567_v39, %v1566_v62  ;;  %v1574_v4 = vrot.slane %v1573_v1, 2  ;;  %v2146_v62 = vld [vmem:[#allocation6 + $0x1d0] sm:$0xff]  ;;  %v2143_v39 = vld [vmem:[#allocation6 + $0x1b8] sm:$0xff] }
 0x1c5   :  { %v1569_v5 = vrot.slane %v1568_v2, 1  ;;  %v1575_v44 = vadd.f32 %v1574_v4, %v1573_v1  ;;  %v2140_v1 = vld [vmem:[#allocation6 + $0x1a0] sm:$0xff]  ;;  %v2137_v4 = vld [vmem:[#allocation6 + $0x188] sm:$0xff] }
 0x1c7   :  { %v1570_v6 = vadd.f32 %v1569_v5, %v1568_v2  ;;  %v1576_v7 = vrot.slane %v1575_v44, 1  ;;  %v2142_v2 = vld [vmem:[#allocation6 + $0x1b0] sm:$0xff]  ;;  %v2139_v5 = vld [vmem:[#allocation6 + $0x198] sm:$0xff] }
 0x1c9   :  { %v1581_v8 = vmul.f32 0.5, %v1570_v6  ;;  %v1577_v9 = vadd.f32 %v1576_v7, %v1575_v44  ;;  %v2136_v44 = vld [vmem:[#allocation6 + $0x180] sm:$0xff]  ;;  %v2138_v6 = vld [vmem:[#allocation6 + $0x190] sm:$0xff]  ;;  %v2133_v7 = vld [vmem:[#allocation6 + $0x168] sm:$0xff] }
 0x1cb   :  { %v1585_v10 = vsub.f32 %v1547_v54, %v1581_v8  ;;  %v1582_v11 = vmul.f32 0.5, %v1577_v9  ;;  %v2135_v8 = vld [vmem:[#allocation6 + $0x178] sm:$0xff]  ;;  %v2132_v9 = vld [vmem:[#allocation6 + $0x160] sm:$0xff] }
 0x1cd   :  { %v1589_v12 = vmul.f32 %v1585_v10, %v1585_v10  ;;  %v1586_v14 = vsub.f32 %v1548_v59, %v1582_v11  ;;  %v1663_v49 = vmul.f32 %v1656_v23, %v1585_v10  ;;  %v2145_v59 = vld [vmem:[#allocation6 + $0x1c8] sm:$0xff]  ;;  %v2134_v10 = vld [vmem:[#allocation6 + $0x170] sm:$0xff] }
 0x1ce   :  { %2154 = vmatprep.subr.mxu0 %v2145_v59  ;;  %v2129_v11 = vld [vmem:[#allocation6 + $0x148] sm:$0xff]  ;;  %v2088_v59 = vld [vmem:[#allocation6] sm:$0xff] }
 0x1cf   :  { %v1605_v15 = vsel %vm1549_vm0, %v1589_v12, 0.0  ;;  %v1590_v16 = vmul.f32 %v1586_v14, %v1586_v14  ;;  %v1664_v50 = vmul.f32 %v1660_v45, %v1586_v14  ;;  %2155 = vmatpush1.msra.mxu0 %v2144_v61  ;;  %v2131_v12 = vld [vmem:[#allocation6 + $0x158] sm:$0xff]  ;;  %v2128_v14 = vld [vmem:[#allocation6 + $0x140] sm:$0xff]  ;;  %v2105_v23 = vld [vmem:[#allocation6 + $0x88] sm:$0xff]  ;;  %v5104_v61 = vmov 0.0  }
 0x1d0   :  { %v1606_v17 = vrot.slane %v1605_v15, 4  ;;  %2156 = vmatprep.subr.mxu0 %v2141_v0  ;;  %v2107_v45 = vld [vmem:[#allocation6 + $0x98] sm:$0xff]  ;;  %2216 = vmatprep.mubr.f32.mxu0 %v5104_v61  ;;  %v4677_v0 = vld [vmem:[#allocation7 + $0x454] ss:$24 sps:$4 sm:$0xff]  }
 0x1d1   :  { %v1612_v19 = vsel %vm1549_vm0, %v1590_v16, 0.0  ;;  %2157 = vmatpush1.msra.mxu0 %v2140_v1  ;;  %v2125_v16 = vld [vmem:[#allocation6 + $0x128] sm:$0xff] }
 0x1d2   :  { %v1607_v20 = vadd.f32 %v1606_v17, %v1605_v15  ;;  %v1613_v21 = vrot.slane %v1612_v19, 4  ;;  %2158 = vmatprep.subr.mxu0 %v2137_v4  ;;  %v2130_v15 = vld [vmem:[#allocation6 + $0x150] sm:$0xff]  ;;  %v2127_v17 = vld [vmem:[#allocation6 + $0x138] sm:$0xff] }
 0x1d3   :  { %2159 = vmatpush1.msra.mxu0 %v2136_v44 }
 0x1d4   :  { %v1608_v22 = vrot.slane %v1607_v20, 2  ;;  %v1614_v24 = vadd.f32 %v1613_v21, %v1612_v19  ;;  %2160 = vmatprep.subr.mxu0 %v2133_v7  ;;  %v2124_v19 = vld [vmem:[#allocation6 + $0x120] sm:$0xff]  ;;  %v2121_v21 = vld [vmem:[#allocation6 + $0x108] sm:$0xff] }
 0x1d5   :  { %2161 = vmatpush1.msra.mxu0 %v2132_v9 }
 0x1d6   :  { %v1609_v25 = vadd.f32 %v1608_v22, %v1607_v20  ;;  %v1615_v27 = vrot.slane %v1614_v24, 2  ;;  %2162 = vmatprep.subr.mxu0 %v2129_v11  ;;  %v2126_v20 = vld [vmem:[#allocation6 + $0x130] sm:$0xff]  ;;  %v2123_v22 = vld [vmem:[#allocation6 + $0x118] sm:$0xff] }
 0x1d7   :  { %2163 = vmatpush1.msra.mxu0 %v2128_v14 }
 0x1d8   :  { %v1610_v29 = vrot.slane %v1609_v25, 1  ;;  %v1616_v30 = vadd.f32 %v1615_v27, %v1614_v24  ;;  %2164 = vmatprep.subr.mxu0 %v2125_v16  ;;  %v2120_v24 = vld [vmem:[#allocation6 + $0x100] sm:$0xff]  ;;  %v2117_v27 = vld [vmem:[#allocation6 + $0xe8] sm:$0xff] }
 0x1d9   :  { %2165 = vmatpush1.msra.mxu0 %v2124_v19 }
 0x1da   :  { %v1611_v36 = vadd.f32 %v1610_v29, %v1609_v25  ;;  %v1617_v37 = vrot.slane %v1616_v30, 1  ;;  %2166 = vmatprep.subr.mxu0 %v2121_v21  ;;  %v2122_v25 = vld [vmem:[#allocation6 + $0x110] sm:$0xff]  ;;  %v2119_v29 = vld [vmem:[#allocation6 + $0xf8] sm:$0xff] }
 0x1db   :  { %2167 = vmatpush1.msra.mxu0 %v2120_v24 }
 0x1dc   :  { %v1621_v38 = vmul.f32 0.5, %v1611_v36  ;;  %v1618_v18 = vadd.f32 %v1617_v37, %v1616_v30  ;;  %v2116_v30 = vld [vmem:[#allocation6 + $0xe0] sm:$0xff]  ;;  %v2118_v36 = vld [vmem:[#allocation6 + $0xf0] sm:$0xff]  ;;  %2168 = vmatprep.subr.mxu0 %v2117_v27  ;;  %v2113_v37 = vld [vmem:[#allocation6 + $0xc8] sm:$0xff] }
 0x1dd   :  { %2169 = vmatpush1.msra.mxu0 %v2116_v30 }
 0x1de   :  { %v1667_v63 = vadd.f32 1e-05, %v1621_v38  ;;  %v1622_v13 = vmul.f32 0.5, %v1618_v18  ;;  %v2115_v38 = vld [vmem:[#allocation6 + $0xd8] sm:$0xff]  ;;  %v2112_v18 = vld [vmem:[#allocation6 + $0xc0] sm:$0xff]  ;;  %2170 = vmatprep.subr.mxu0 %v2113_v37 }
 0x1df   :  { %2171 = vmatpush1.msra.mxu0 %v2112_v18 }
 0x1e0   :  { %4964 = vrsqrt.f32 %v1667_v63  ;;  %v1668_v40 = vadd.f32 1e-05, %v1622_v13  ;;  %v2114_v63 = vld [vmem:[#allocation6 + $0xd0] sm:$0xff]  ;;  %v2109_v13 = vld [vmem:[#allocation6 + $0xa8] sm:$0xff] }
 0x1e1   :  { %2172 = vmatprep.subr.mxu0 %v2109_v13 }
 0x1e2   :  { %4966 = vrsqrt.f32 %v1668_v40  ;;  %v2111_v40 = vld [vmem:[#allocation6 + $0xb8] sm:$0xff]  ;;  %2173 = vmatpush1.msra.mxu0 %v2108_v42 }
 0x1e3   :  { %2174 = vmatprep.subr.mxu0 %v2105_v23 }
 0x1e4   :  { %2175 = vmatpush1.msra.mxu0 %v2104_v46 }
 0x1ed   :  { %v4965_v48 = vpop.eup %4964 }
 0x1ee   :  { %v1675_v53 = vmul.f32 %v4965_v48, %v1663_v49  ;;  %v2101_v48 = vld [vmem:[#allocation6 + $0x68] sm:$0xff]  ;;  %v2103_v49 = vld [vmem:[#allocation6 + $0x78] sm:$0xff] }
 0x1ef   :  { %v4967_v52 = vpop.eup %4966  ;;  %2176 = vmatprep.subr.mxu0 %v2101_v48 }
 0x1f0   :  { %v1676_v35 = vmul.f32 %v4967_v52, %v1664_v50  ;;  %v1715_v54 = vadd.f32 %v1708_v34, %v1675_v53  ;;  %v2100_v50 = vld [vmem:[#allocation6 + $0x60] sm:$0xff]  ;;  %v2097_v52 = vld [vmem:[#allocation6 + $0x48] sm:$0xff]  ;;  %v2099_v53 = vld [vmem:[#allocation6 + $0x58] sm:$0xff] }
 0x1f1   :  { %v2096_v34 = vld [vmem:[#allocation6 + $0x40] sm:$0xff]  ;;  %2177 = vmatpush1.msra.mxu0 %v2100_v50 }
 0x1f2   :  { %v1716_v32 = vadd.f32 %v1712_v51, %v1676_v35  ;;  %v2102_v51 = vld [vmem:[#allocation6 + $0x70] sm:$0xff]  ;;  %2178 = vmatprep.subr.mxu0 %v2097_v52 }
 0x1f3   :  { %v2098_v35 = vld [vmem:[#allocation6 + $0x50] sm:$0xff]  ;;  %2179 = vmatpush1.msra.mxu0 %v2096_v34  ;;  %v5280_v34 = vsub.s32 2, %v5173_v43 }
 0x1f4   :  { %1980 = vmatprep.mubr.f32.mxu1 %v1716_v32  ;;  %v2093_v32 = vld [vmem:[#allocation6 + $0x28] sm:$0xff] }
 0x1f5   :  { %1981 = vmatmul.mubr.f32.vlgmr.msra.gmra.mxu1 %v1715_v54  ;;  %v2095_v54 = vld [vmem:[#allocation6 + $0x38] sm:$0xff]  ;;  %2180 = vmatprep.subr.mxu0 %v2093_v32 }
 0x1f6   :  { %2224 = vmatpush1.msra.mxu1 %v2150_v58  ;;  %v2091_v58 = vld [vmem:[#allocation6 + $0x18] sm:$0xff]  ;;  %2181 = vmatpush1.msra.mxu0 %v2092_v55 }
 0x1f7   :  { %2225 = vmatprep.subr.mxu1 %v2147_v60  ;;  %v2090_v60 = vld [vmem:[#allocation6 + $0x10] sm:$0xff]  ;;  %2182 = vmatprep.subr.mxu0 %v2089_v57 }
 0x1f8   :  { %2226 = vmatpush1.msra.mxu1 %v2146_v62  ;;  %2183 = vmatpush1.msra.mxu0 %v2088_v59  ;;  %v4674_v62 = vld [vmem:[#allocation7 + $0x154] ss:$24 sps:$4 sm:$0xff]  }
 0x1f9   :  { %2227 = vmatprep.subr.mxu1 %v2143_v39  ;;  %2287 = vmatprep.mubr.f32.mxu1 %v5104_v61 }
 0x1fa   :  { %2228 = vmatpush1.msra.mxu1 %v2142_v2  ;;  %3650 = vmatprep.subr.bf16.mxu0 %v4674_v62 }
 0x1fb   :  { %2229 = vmatprep.subr.mxu1 %v2139_v5 }
 0x1fc   :  { %2230 = vmatpush1.msra.mxu1 %v2138_v6 }
 0x1fd   :  { %2231 = vmatprep.subr.mxu1 %v2135_v8 }
 0x1fe   :  { %2232 = vmatpush1.msra.mxu1 %v2134_v10 }
 0x1ff   :  { %2233 = vmatprep.subr.mxu1 %v2131_v12 }
 0x200   :  { %2234 = vmatpush1.msra.mxu1 %v2130_v15 }
 0x201   :  { %2235 = vmatprep.subr.mxu1 %v2127_v17 }
 0x202   :  { %2236 = vmatpush1.msra.mxu1 %v2126_v20 }
 0x203   :  { %2237 = vmatprep.subr.mxu1 %v2123_v22 }
 0x204   :  { %2238 = vmatpush1.msra.mxu1 %v2122_v25 }
 0x205   :  { %2239 = vmatprep.subr.mxu1 %v2119_v29 }
 0x206   :  { %2240 = vmatpush1.msra.mxu1 %v2118_v36 }
 0x207   :  { %2241 = vmatprep.subr.mxu1 %v2115_v38 }
 0x208   :  { %2242 = vmatpush1.msra.mxu1 %v2114_v63 }
 0x209   :  { %2243 = vmatprep.subr.mxu1 %v2111_v40 }
 0x20a   :  { %2244 = vmatpush1.msra.mxu1 %v2110_v3 }
 0x20b   :  { %2245 = vmatprep.subr.mxu1 %v2107_v45 }
 0x20c   :  { %2246 = vmatpush1.msra.mxu1 %v2106_v47 }
 0x20d   :  { %2247 = vmatprep.subr.mxu1 %v2103_v49 }
 0x20e   :  { %2248 = vmatpush1.msra.mxu1 %v2102_v51 }
 0x20f   :  { %2249 = vmatprep.subr.mxu1 %v2099_v53  ;;  %v91_v53 = vld [vmem:[%s5399_s7] sm:$0xf] }
 0x210   :  { %2250 = vmatpush1.msra.mxu1 %v2098_v35  ;;  %v2027_v35 = vrot.slane %v91_v53, %v5227_v26  ;;  %v2031_v32 = vrot.slane %v91_v53, %v5280_v34 }
 0x211   :  { %2251 = vmatprep.subr.mxu1 %v2095_v54  ;;  %v5285_v54 = vsub.s32 3, %v5173_v43 }
 0x212   :  { %2252 = vmatpush1.msra.mxu1 %v2094_v56  ;;  %v2037_v55 = vrot.slane %v2027_v35, %v5227_v26  ;;  %v2053_v56 = vrot.slane %v91_v53, %v5241_v33  ;;  %v2041_v57 = vrot.slane %v2031_v32, %v5227_v26  ;;  %v4723_v35 = vld [vmem:[#allocation7 + $0x5d0] ss:$24 sps:$4 sm:$0xff]   ;;  %v4728_v32 = vld [vmem:[#allocation7 + $0x2a4] ss:$24 sps:$4 sm:$0xff]  }
 0x213   :  { %2253 = vmatprep.subr.mxu1 %v2091_v58  ;;  %v2057_v58 = vrot.slane %v91_v53, %v5285_v54  ;;  %v4720_v53 = vld [vmem:[#allocation7 + $0x2d0] ss:$24 sps:$4 sm:$0xff]  }
 0x214   :  { %2254 = vmatpush1.msra.mxu1 %v2090_v60  ;;  %v2063_v62 = vrot.slane %v2053_v56, %v5241_v33  ;;  %v4726_v56 = vld [vmem:[#allocation7 + $0x2a0] ss:$24 sps:$4 sm:$0xff]  }
 0x215   :  { %3691 = vmatprep.subr.bf16.mxu1 %v4677_v0 }
 0x273   :  { %v1911_v39 = vpop.f32.mrf.mxu0 }
 0x275   :  { %v1913_v4 = vpop.f32.mrf.mxu0 }
 0x2b5   :  { %v1982_v1 = vpop.f32.mrf.mxu1 }
 0x2b6   :  { %v1983_v2 = vadd.f32 %v1982_v1, %v1911_v39  ;;  %v2067_v39 = vrot.slane %v2057_v58, %v5241_v33  ;;  %v4734_v58 = vld [vmem:[#allocation7 + $0x274] ss:$24 sps:$4 sm:$0xff]  }
 0x2b7   :  { %v1984_v5 = vpop.f32.mrf.mxu1 }
 0x2b8   :  { %v1987_v44 = vsel %vm1549_vm0, %v1983_v2, 0.0  ;;  %v1985_v6 = vadd.f32 %v1984_v5, %v1913_v4 }
 0x2b9   :  { %v1988_v7 = vrot.slane %v1987_v44, 4 }
 0x2ba   :  { %v1994_v8 = vsel %vm1549_vm0, %v1985_v6, 0.0 }
 0x2bb   :  { %v1989_v9 = vadd.f32 %v1988_v7, %v1987_v44  ;;  %v1995_v10 = vrot.slane %v1994_v8, 4 }
 0x2bd   :  { %v1990_v11 = vrot.slane %v1989_v9, 2  ;;  %v1996_v12 = vadd.f32 %v1995_v10, %v1994_v8  ;;  %v2082_v8 = vld [vmem:[%s5393_s1] sm:$0x3] }
 0x2bf   :  { %v1991_v14 = vadd.f32 %v1990_v11, %v1989_v9  ;;  %v1997_v15 = vrot.slane %v1996_v12, 2  ;;  %v4672_v11 = vld [vmem:[#allocation7 + $0x150] ss:$24 sps:$4 sm:$0xff]  }
 0x2c1   :  { %v1992_v16 = vrot.slane %v1991_v14, 1  ;;  %v1998_v17 = vadd.f32 %v1997_v15, %v1996_v12  ;;  %v4675_v12 = vld [vmem:[#allocation7 + $0x450] ss:$24 sps:$4 sm:$0xff]   ;;  %v4680_v15 = vld [vmem:[#allocation7 + $0x124] ss:$24 sps:$4 sm:$0xff]  }
 0x2c3   :  { %v1993_v19 = vadd.f32 %v1992_v16, %v1991_v14  ;;  %v1999_v20 = vrot.slane %v1998_v17, 1  ;;  %v4683_v16 = vld [vmem:[#allocation7 + $0x424] ss:$24 sps:$4 sm:$0xff]  }
 0x2c5   :  { %v2001_v21 = vmul.f32 0.5, %v1993_v19  ;;  %v2000_v22 = vadd.f32 %v1999_v20, %v1998_v17  ;;  %v4678_v17 = vld [vmem:[#allocation7 + $0x120] ss:$24 sps:$4 sm:$0xff]   ;;  %v4686_v20 = vld [vmem:[#allocation7 + $0xf4] ss:$24 sps:$4 sm:$0xff]  }
 0x2c6   :  { %v4681_v19 = vld [vmem:[#allocation7 + $0x420] ss:$24 sps:$4 sm:$0xff]  }
 0x2c7   :  { %v2003_v24 = vsub.f32 %v1983_v2, %v2001_v21  ;;  %v2002_v25 = vmul.f32 0.5, %v2000_v22  ;;  %v4689_v21 = vld [vmem:[#allocation7 + $0x3f4] ss:$24 sps:$4 sm:$0xff]   ;;  %v4684_v22 = vld [vmem:[#allocation7 + $0xf0] ss:$24 sps:$4 sm:$0xff]  }
 0x2c9   :  { %v2005_v27 = vmul.f32 %v2003_v24, %v2003_v24  ;;  %v2004_v29 = vsub.f32 %v1985_v6, %v2002_v25  ;;  %v2042_v59 = vmul.f32 %v2037_v55, %v2003_v24  ;;  %v4687_v24 = vld [vmem:[#allocation7 + $0x3f0] ss:$24 sps:$4 sm:$0xff]   ;;  %v4692_v25 = vld [vmem:[#allocation7 + $0xc4] ss:$24 sps:$4 sm:$0xff]  }
 0x2ca   :  { %v4731_v55 = vld [vmem:[#allocation7 + $0x5a4] ss:$24 sps:$4 sm:$0xff]  }
 0x2cb   :  { %v2007_v30 = vsel %vm1549_vm0, %v2005_v27, 0.0  ;;  %v2006_v36 = vmul.f32 %v2004_v29, %v2004_v29  ;;  %v2043_v0 = vmul.f32 %v2041_v57, %v2004_v29  ;;  %v4695_v27 = vld [vmem:[#allocation7 + $0x3c4] ss:$24 sps:$4 sm:$0xff]   ;;  %v4690_v29 = vld [vmem:[#allocation7 + $0xc0] ss:$24 sps:$4 sm:$0xff]  }
 0x2cc   :  { %v2008_v37 = vrot.slane %v2007_v30, 4  ;;  %v4729_v57 = vld [vmem:[#allocation7 + $0x5a0] ss:$24 sps:$4 sm:$0xff]  }
 0x2cd   :  { %v2014_v38 = vsel %vm1549_vm0, %v2006_v36, 0.0  ;;  %v4698_v36 = vld [vmem:[#allocation7 + $0x94] ss:$24 sps:$4 sm:$0xff]  }
 0x2ce   :  { %v2009_v18 = vadd.f32 %v2008_v37, %v2007_v30  ;;  %v2015_v63 = vrot.slane %v2014_v38, 4  ;;  %v4693_v30 = vld [vmem:[#allocation7 + $0x3c0] ss:$24 sps:$4 sm:$0xff]   ;;  %v4701_v37 = vld [vmem:[#allocation7 + $0x394] ss:$24 sps:$4 sm:$0xff]  }
 0x2d0   :  { %v2010_v13 = vrot.slane %v2009_v18, 2  ;;  %v2016_v40 = vadd.f32 %v2015_v63, %v2014_v38  ;;  %v4696_v38 = vld [vmem:[#allocation7 + $0x90] ss:$24 sps:$4 sm:$0xff]   ;;  %v4704_v63 = vld [vmem:[#allocation7 + $0x64] ss:$24 sps:$4 sm:$0xff]  }
 0x2d2   :  { %v2011_v42 = vadd.f32 %v2010_v13, %v2009_v18  ;;  %v2017_v3 = vrot.slane %v2016_v40, 2  ;;  %v4699_v18 = vld [vmem:[#allocation7 + $0x390] ss:$24 sps:$4 sm:$0xff]   ;;  %v4707_v13 = vld [vmem:[#allocation7 + $0x364] ss:$24 sps:$4 sm:$0xff]  }
 0x2d4   :  { %v2012_v23 = vrot.slane %v2011_v42, 1  ;;  %v2018_v45 = vadd.f32 %v2017_v3, %v2016_v40  ;;  %v4702_v40 = vld [vmem:[#allocation7 + $0x60] ss:$24 sps:$4 sm:$0xff]   ;;  %v4710_v3 = vld [vmem:[#allocation7 + $0x34] ss:$24 sps:$4 sm:$0xff]  }
 0x2d6   :  { %v2013_v46 = vadd.f32 %v2012_v23, %v2011_v42  ;;  %v2019_v47 = vrot.slane %v2018_v45, 1  ;;  %v4705_v42 = vld [vmem:[#allocation7 + $0x360] ss:$24 sps:$4 sm:$0xff]   ;;  %v4713_v23 = vld [vmem:[#allocation7 + $0x334] ss:$24 sps:$4 sm:$0xff]  }
 0x2d8   :  { %v2021_v48 = vmul.f32 0.5, %v2013_v46  ;;  %v2020_v49 = vadd.f32 %v2019_v47, %v2018_v45  ;;  %v4708_v45 = vld [vmem:[#allocation7 + $0x30] ss:$24 sps:$4 sm:$0xff]   ;;  %v4716_v47 = vld [vmem:[#allocation7 + $0x4] ss:$24 sps:$4 sm:$0xff]  }
 0x2d9   :  { %v4711_v46 = vld [vmem:[#allocation7 + $0x330] ss:$24 sps:$4 sm:$0xff]  }
 0x2da   :  { %v2044_v50 = vadd.f32 1e-05, %v2021_v48  ;;  %v2022_v51 = vmul.f32 0.5, %v2020_v49  ;;  %v4719_v48 = vld [vmem:[#allocation7 + $0x304] ss:$24 sps:$4 sm:$0xff]  }
 0x2db   :  { %v4714_v49 = vld [vmem:[#allocation7] ss:$24 sps:$4 sm:$0xff]  }
 0x2dc   :  { %4968 = vrsqrt.f32 %v2044_v50  ;;  %v2045_v52 = vadd.f32 1e-05, %v2022_v51  ;;  %v4717_v50 = vld [vmem:[#allocation7 + $0x300] ss:$24 sps:$4 sm:$0xff]   ;;  %v4722_v51 = vld [vmem:[#allocation7 + $0x2d4] ss:$24 sps:$4 sm:$0xff]  }
 0x2de   :  { %4970 = vrsqrt.f32 %v2045_v52  ;;  %v4725_v52 = vld [vmem:[#allocation7 + $0x5d4] ss:$24 sps:$4 sm:$0xff]  }
 0x2e9   :  { %v4969_v60 = vpop.eup %4968 }
 0x2ea   :  { %v2048_v61 = vmul.f32 %v4969_v60, %v2042_v59  ;;  %v4737_v59 = vld [vmem:[#allocation7 + $0x574] ss:$24 sps:$4 sm:$0xff]   ;;  %v4732_v60 = vld [vmem:[#allocation7 + $0x270] ss:$24 sps:$4 sm:$0xff]  }
 0x2eb   :  { %v4971_v1 = vpop.eup %4970 }
 0x2ec   :  { %v2049_v2 = vmul.f32 %v4971_v1, %v2043_v0  ;;  %v2068_v4 = vadd.f32 %v2063_v62, %v2048_v61  ;;  %v4735_v61 = vld [vmem:[#allocation7 + $0x570] ss:$24 sps:$4 sm:$0xff]   ;;  %v4740_v62 = vld [vmem:[#allocation7 + $0x244] ss:$24 sps:$4 sm:$0xff]   ;;  %v4741_v1 = vld [vmem:[#allocation7 + $0x540] ss:$24 sps:$4 sm:$0xff]  }
 0x2ed   :  { %v4743_v0 = vld [vmem:[#allocation7 + $0x544] ss:$24 sps:$4 sm:$0xff]  }
 0x2ee   :  { %v2069_v5 = vadd.f32 %v2067_v39, %v2049_v2  ;;  %v4738_v39 = vld [vmem:[#allocation7 + $0x240] ss:$24 sps:$4 sm:$0xff]   ;;  %v4746_v2 = vld [vmem:[#allocation7 + $0x214] ss:$24 sps:$4 sm:$0xff]  }
 0x2f0   :  { %v2072_v44 = vcombine.low %v2068_v4, %v2069_v5  ;;  %v2083_v6 = vmul.f32 0.5, %v2069_v5  ;;  %v4744_v5 = vld [vmem:[#allocation7 + $0x210] ss:$24 sps:$4 sm:$0xff]  }
 0x2f2   :  { %4170 = vst.sshfl [vmem:[%s5401_s9] sm:$0x33 pattern:$0x76325410] %v2072_v44  ;;  %v2084_v7 = vmul.f32 1.442695, %v2083_v6 }
 0x2f3   :  { %v4747_v44 = vld [vmem:[#allocation7 + $0x510] ss:$24 sps:$4 sm:$0xff]   ;;  %v4752_v6 = vld [vmem:[#allocation7 + $0x1e4] ss:$24 sps:$4 sm:$0xff]  }
 0x2f4   :  { %4972 = vpow2.f32 %v2084_v7  ;;  %v4755_v7 = vld [vmem:[#allocation7 + $0x4e4] ss:$24 sps:$4 sm:$0xff]  }
 0x301   :  { %v4973_v9 = vpop.eup %4972 }
 0x302   :  { %v2086_v10 = vmul.f32 %v4973_v9, %v2082_v8  ;;  %v4750_v8 = vld [vmem:[#allocation7 + $0x1e0] ss:$24 sps:$4 sm:$0xff]  }
 0x303   :  { %v4753_v9 = vld [vmem:[#allocation7 + $0x4e0] ss:$24 sps:$4 sm:$0xff]  }
 0x304   :  { %v2087_v14 = vadd.f32 %v2086_v10, %v2068_v4  ;;  %v4749_v4 = vld [vmem:[#allocation7 + $0x514] ss:$24 sps:$4 sm:$0xff]  }
 0x305   :  { %v4758_v10 = vld [vmem:[#allocation7 + $0x1b4] ss:$24 sps:$4 sm:$0xff]  }
 0x306   :  { %2217 = vmatmul.mubr.f32.vlgmr.msra.gmra.mxu0 %v2087_v14  ;;  %2288 = vmatmul.mubr.f32.vlgmr.msra.gmra.mxu1 %v2087_v14  ;;  %v4759_v14 = vld [vmem:[#allocation7 + $0x4b0] ss:$24 sps:$4 sm:$0xff]  }
 0x307   :  { %3651 = vmatpush1.bf16.msra.mxu0 %v4672_v11  ;;  %3692 = vmatpush1.bf16.msra.mxu1 %v4675_v12  ;;  %v4761_v11 = vld [vmem:[#allocation7 + $0x4b4] ss:$24 sps:$4 sm:$0xff]   ;;  %v4756_v12 = vld [vmem:[#allocation7 + $0x1b0] ss:$24 sps:$4 sm:$0xff]  }
 0x308   :  { %3652 = vmatprep.subr.bf16.mxu0 %v4680_v15  ;;  %3693 = vmatprep.subr.bf16.mxu1 %v4683_v16  ;;  %v4764_v15 = vld [vmem:[#allocation7 + $0x184] ss:$24 sps:$4 sm:$0xff]  }
 0x309   :  { %v4767_v16 = vld [vmem:[#allocation7 + $0x484] ss:$24 sps:$4 sm:$0xff]  }
 0x30b   :  { %3653 = vmatpush1.bf16.msra.mxu0 %v4678_v17  ;;  %3694 = vmatpush1.bf16.msra.mxu1 %v4681_v19  ;;  %v4762_v17 = vld [vmem:[#allocation7 + $0x180] ss:$24 sps:$4 sm:$0xff]  }
 0x30c   :  { %3654 = vmatprep.subr.bf16.mxu0 %v4686_v20  ;;  %3695 = vmatprep.subr.bf16.mxu1 %v4689_v21  ;;  %v4765_v19 = vld [vmem:[#allocation7 + $0x480] ss:$24 sps:$4 sm:$0xff]   ;;  %v4770_v20 = vld [vmem:[#allocation7 + $0x15c] ss:$24 sps:$4 sm:$0xff]  }
 0x30d   :  { %v4773_v21 = vld [vmem:[#allocation7 + $0x45c] ss:$24 sps:$4 sm:$0xff]  }
 0x30f   :  { %3655 = vmatpush1.bf16.msra.mxu0 %v4684_v22  ;;  %3696 = vmatpush1.bf16.msra.mxu1 %v4687_v24 }
 0x310   :  { %3656 = vmatprep.subr.bf16.mxu0 %v4692_v25  ;;  %3697 = vmatprep.subr.bf16.mxu1 %v4695_v27 }
 0x313   :  { %3657 = vmatpush1.bf16.msra.mxu0 %v4690_v29  ;;  %3698 = vmatpush1.bf16.msra.mxu1 %v4693_v30 }
 0x314   :  { %3658 = vmatprep.subr.bf16.mxu0 %v4698_v36  ;;  %3699 = vmatprep.subr.bf16.mxu1 %v4701_v37 }
 0x317   :  { %3659 = vmatpush1.bf16.msra.mxu0 %v4696_v38  ;;  %3700 = vmatpush1.bf16.msra.mxu1 %v4699_v18 }
 0x318   :  { %3660 = vmatprep.subr.bf16.mxu0 %v4704_v63  ;;  %3701 = vmatprep.subr.bf16.mxu1 %v4707_v13 }
 0x31b   :  { %3661 = vmatpush1.bf16.msra.mxu0 %v4702_v40  ;;  %3702 = vmatpush1.bf16.msra.mxu1 %v4705_v42 }
 0x31c   :  { %3662 = vmatprep.subr.bf16.mxu0 %v4710_v3  ;;  %3703 = vmatprep.subr.bf16.mxu1 %v4713_v23 }
 0x31f   :  { %3663 = vmatpush1.bf16.msra.mxu0 %v4708_v45  ;;  %3704 = vmatpush1.bf16.msra.mxu1 %v4711_v46 }
 0x320   :  { %3664 = vmatprep.subr.bf16.mxu0 %v4716_v47  ;;  %3705 = vmatprep.subr.bf16.mxu1 %v4719_v48 }
 0x323   :  { %3665 = vmatpush1.bf16.msra.mxu0 %v4714_v49  ;;  %3706 = vmatpush1.bf16.msra.mxu1 %v4717_v50 }
 0x324   :  { %3666 = vmatprep.subr.bf16.mxu0 %v4722_v51  ;;  %3707 = vmatprep.subr.bf16.mxu1 %v4725_v52 }
 0x327   :  { %3667 = vmatpush2.bf16.msra.mxu0 %v4720_v53  ;;  %3708 = vmatpush2.bf16.msra.mxu1 %v4723_v35 }
 0x328   :  { %3668 = vmatprep.subr.bf16.mxu0 %v4728_v32  ;;  %3709 = vmatprep.subr.bf16.mxu1 %v4731_v55 }
 0x32b   :  { %3669 = vmatpush2.bf16.msra.mxu0 %v4726_v56  ;;  %3710 = vmatpush2.bf16.msra.mxu1 %v4729_v57 }
 0x32c   :  { %3670 = vmatprep.subr.bf16.mxu0 %v4734_v58  ;;  %3711 = vmatprep.subr.bf16.mxu1 %v4737_v59 }
 0x32f   :  { %3671 = vmatpush2.bf16.msra.mxu0 %v4732_v60  ;;  %3712 = vmatpush2.bf16.msra.mxu1 %v4735_v61 }
 0x330   :  { %3672 = vmatprep.subr.bf16.mxu0 %v4740_v62  ;;  %3713 = vmatprep.subr.bf16.mxu1 %v4743_v0 }
 0x333   :  { %3673 = vmatpush2.bf16.msra.mxu0 %v4738_v39  ;;  %3714 = vmatpush2.bf16.msra.mxu1 %v4741_v1 }
 0x334   :  { %3674 = vmatprep.subr.bf16.mxu0 %v4746_v2  ;;  %3715 = vmatprep.subr.bf16.mxu1 %v4749_v4 }
 0x337   :  { %3675 = vmatpush2.bf16.msra.mxu0 %v4744_v5  ;;  %3716 = vmatpush2.bf16.msra.mxu1 %v4747_v44 }
 0x338   :  { %3676 = vmatprep.subr.bf16.mxu0 %v4752_v6  ;;  %3717 = vmatprep.subr.bf16.mxu1 %v4755_v7 }
 0x33b   :  { %3677 = vmatpush2.bf16.msra.mxu0 %v4750_v8  ;;  %3718 = vmatpush2.bf16.msra.mxu1 %v4753_v9 }
 0x33c   :  { %3678 = vmatprep.subr.bf16.mxu0 %v4758_v10  ;;  %3719 = vmatprep.subr.bf16.mxu1 %v4761_v11 }
 0x33f   :  { %3679 = vmatpush2.bf16.msra.mxu0 %v4756_v12  ;;  %3720 = vmatpush2.bf16.msra.mxu1 %v4759_v14 }
 0x340   :  { %3680 = vmatprep.subr.bf16.mxu0 %v4764_v15  ;;  %3721 = vmatprep.subr.bf16.mxu1 %v4767_v16 }
 0x343   :  { %3681 = vmatpush2.bf16.msra.mxu0 %v4762_v17  ;;  %3722 = vmatpush2.bf16.msra.mxu1 %v4765_v19 }
 0x344   :  { %3732 = vmatprep.subr.bf16.mxu0 %v4770_v20  ;;  %3773 = vmatprep.subr.bf16.mxu1 %v4773_v21 }
 0x3c6   :  { %v2218_v22 = vpop.f32.mrf.mxu0  ;;  %v2289_v24 = vpop.f32.mrf.mxu1 }
 0x3c7   :  { %v2294_v25 = vmax.f32 %v2218_v22, 0.0  ;;  %v2296_v27 = vmax.f32 %v2289_v24, 0.0 }
 0x3c8   :  { %v2220_v29 = vpop.f32.mrf.mxu0  ;;  %v2291_v30 = vpop.f32.mrf.mxu1 }
 0x3c9   :  { %v2298_v36 = vsel %vm1549_vm0, %v2294_v25, 0.0  ;;  %v2312_v37 = vsel %vm1549_vm0, %v2296_v27, 0.0  ;;  %v2295_v38 = vmax.f32 %v2220_v29, 0.0  ;;  %v2297_v18 = vmax.f32 %v2291_v30, 0.0 }
 0x3ca   :  { %v2299_v63 = vrot.slane %v2298_v36, 4  ;;  %v2313_v13 = vrot.slane %v2312_v37, 4 }
 0x3cb   :  { %v2305_v40 = vsel %vm1549_vm0, %v2295_v38, 0.0  ;;  %v2319_v42 = vsel %vm1549_vm0, %v2297_v18, 0.0 }
 0x3cc   :  { %v2300_v3 = vadd.f32 %v2299_v63, %v2298_v36  ;;  %v2314_v23 = vadd.f32 %v2313_v13, %v2312_v37  ;;  %v2306_v45 = vrot.slane %v2305_v40, 4  ;;  %v2320_v46 = vrot.slane %v2319_v42, 4 }
 0x3ce   :  { %v2301_v47 = vrot.slane %v2300_v3, 2  ;;  %v2315_v48 = vrot.slane %v2314_v23, 2  ;;  %v2307_v49 = vadd.f32 %v2306_v45, %v2305_v40  ;;  %v2321_v50 = vadd.f32 %v2320_v46, %v2319_v42 }
 0x3d0   :  { %v2302_v51 = vadd.f32 %v2301_v47, %v2300_v3  ;;  %v2316_v52 = vadd.f32 %v2315_v48, %v2314_v23  ;;  %v2308_v53 = vrot.slane %v2307_v49, 2  ;;  %v2322_v35 = vrot.slane %v2321_v50, 2 }
 0x3d2   :  { %v2303_v32 = vrot.slane %v2302_v51, 1  ;;  %v2317_v55 = vrot.slane %v2316_v52, 1  ;;  %v2309_v56 = vadd.f32 %v2308_v53, %v2307_v49  ;;  %v2323_v57 = vadd.f32 %v2322_v35, %v2321_v50 }
 0x3d4   :  { %v2304_v58 = vadd.f32 %v2303_v32, %v2302_v51  ;;  %v2318_v59 = vadd.f32 %v2317_v55, %v2316_v52  ;;  %v2310_v60 = vrot.slane %v2309_v56, 1  ;;  %v2324_v61 = vrot.slane %v2323_v57, 1 }
 0x3d6   :  { %v2326_v62 = vmul.f32 0.5, %v2304_v58  ;;  %v2328_v0 = vmul.f32 0.5, %v2318_v59  ;;  %v2311_v39 = vadd.f32 %v2310_v60, %v2309_v56  ;;  %v2325_v1 = vadd.f32 %v2324_v61, %v2323_v57  ;;  %v5006_v57 = vld [vmem:[%s5398_s6] sm:$0xff] }
 0x3d7   :  { %v2376_v56 = vsub.s32 6, %v5173_v43  ;;  %v2373_v58 = vrot.slane %v5006_v57, %v5280_v34  ;;  %v2381_v59 = vrot.slane %v5258_v41, %v5280_v34  ;;  %v2428_v61 = vsub.s32 7, %v5173_v43 }
 0x3d8   :  { %v5303_v2 = vsub.f32 %v2294_v25, %v2326_v62  ;;  %v5305_v4 = vsub.f32 %v2296_v27, %v2328_v0  ;;  %v2327_v5 = vmul.f32 0.5, %v2311_v39  ;;  %v2329_v44 = vmul.f32 0.5, %v2325_v1 }
 0x3d9   :  { %v2377_v60 = vrot.slane %v5006_v57, %v2376_v56  ;;  %v2393_v62 = vrot.slane %v2373_v58, %v5280_v34  ;;  %v2385_v0 = vrot.slane %v5258_v41, %v2376_v56  ;;  %v2401_v39 = vrot.slane %v2381_v59, %v5280_v34  ;;  %v4800_v56 = vld [vmem:[#allocation7 + $0x6c] ss:$24 sps:$4 sm:$0xff]   ;;  %v4798_v58 = vld [vmem:[#allocation7 + $0x68] ss:$24 sps:$4 sm:$0xff]  }
 0x3da   :  { %v2334_v6 = vmul.f32 %v5303_v2, %v5303_v2  ;;  %v2336_v7 = vmul.f32 %v5305_v4, %v5305_v4  ;;  %v5311_v8 = vsub.f32 %v2295_v38, %v2327_v5  ;;  %v5313_v9 = vsub.f32 %v2297_v18, %v2329_v44  ;;  %v4801_v59 = vld [vmem:[#allocation7 + $0x368] ss:$24 sps:$4 sm:$0xff]  }
 0x3db   :  { %v2425_v1 = vrot.slane %v5006_v57, %v5285_v54  ;;  %v2397_v5 = vrot.slane %v2377_v60, %v5280_v34  ;;  %v2429_v44 = vrot.slane %v5006_v57, %v2428_v61  ;;  %v4803_v57 = vld [vmem:[#allocation7 + $0x36c] ss:$24 sps:$4 sm:$0xff]   ;;  %v4806_v60 = vld [vmem:[#allocation7 + $0x3c] ss:$24 sps:$4 sm:$0xff]  }
 0x3dc   :  { %v2338_v10 = vsel %vm1549_vm0, %v2334_v6, 0.0  ;;  %v2352_v11 = vsel %vm1549_vm0, %v2336_v7, 0.0  ;;  %v2335_v15 = vmul.f32 %v5311_v8, %v5311_v8  ;;  %v2337_v16 = vmul.f32 %v5313_v9, %v5313_v9 }
 0x3dd   :  { %v2339_v12 = vrot.slane %v2338_v10, 4  ;;  %v2353_v14 = vrot.slane %v2352_v11, 4  ;;  %v2433_v6 = vrot.slane %v5258_v41, %v5285_v54  ;;  %v2406_v7 = vmul.f32 %v2393_v62, %v5303_v2  ;;  %v4804_v62 = vld [vmem:[#allocation7 + $0x38] ss:$24 sps:$4 sm:$0xff]  }
 0x3de   :  { %v2345_v20 = vsel %vm1549_vm0, %v2335_v15, 0.0  ;;  %v2359_v22 = vsel %vm1549_vm0, %v2337_v16, 0.0 }
 0x3df   :  { %v2340_v17 = vadd.f32 %v2339_v12, %v2338_v10  ;;  %v2354_v19 = vadd.f32 %v2353_v14, %v2352_v11  ;;  %v2346_v21 = vrot.slane %v2345_v20, 4  ;;  %v2360_v27 = vrot.slane %v2359_v22, 4 }
 0x3e0   :  { %v2405_v10 = vrot.slane %v2385_v0, %v5280_v34  ;;  %v2437_v11 = vrot.slane %v5258_v41, %v2428_v61  ;;  %v2408_v14 = vmul.f32 %v2401_v39, %v5305_v4  ;;  %v4809_v61 = vld [vmem:[#allocation7 + $0x33c] ss:$24 sps:$4 sm:$0xff]   ;;  %v4807_v0 = vld [vmem:[#allocation7 + $0x338] ss:$24 sps:$4 sm:$0xff]   ;;  %v4812_v39 = vld [vmem:[#allocation7 + $0xc] ss:$24 sps:$4 sm:$0xff]  }
 0x3e1   :  { %v2341_v24 = vrot.slane %v2340_v17, 2  ;;  %v2355_v25 = vrot.slane %v2354_v19, 2  ;;  %v2347_v29 = vadd.f32 %v2346_v21, %v2345_v20  ;;  %v2361_v37 = vadd.f32 %v2360_v27, %v2359_v22 }
 0x3e2   :  { %v2407_v20 = vmul.f32 %v2397_v5, %v5311_v8  ;;  %v2449_v21 = vrot.slane %v2429_v44, %v5285_v54  ;;  %v2453_v22 = vrot.slane %v2433_v6, %v5285_v54  ;;  %v2409_v2 = vmul.f32 %v2405_v10, %v5313_v9  ;;  %v4810_v5 = vld [vmem:[#allocation7 + $0x8] ss:$24 sps:$4 sm:$0xff]   ;;  %v4818_v6 = vld [vmem:[#allocation7 + $0x2dc] ss:$24 sps:$4 sm:$0xff]   ;;  %v4816_v10 = vld [vmem:[#allocation7 + $0x2d8] ss:$24 sps:$4 sm:$0xff]  }
 0x3e3   :  { %v2342_v30 = vadd.f32 %v2341_v24, %v2340_v17  ;;  %v2356_v36 = vadd.f32 %v2355_v25, %v2354_v19  ;;  %v2348_v38 = vrot.slane %v2347_v29, 2  ;;  %v2362_v13 = vrot.slane %v2361_v37, 2  ;;  %v4813_v44 = vld [vmem:[#allocation7 + $0x308] ss:$24 sps:$4 sm:$0xff]  }
 0x3e4   :  { %v2445_v17 = vrot.slane %v2425_v1, %v5285_v54  ;;  %v2457_v25 = vrot.slane %v2437_v11, %v5285_v54  ;;  %v4815_v1 = vld [vmem:[#allocation7 + $0x30c] ss:$24 sps:$4 sm:$0xff]   ;;  %v4819_v11 = vld [vmem:[#allocation7 + $0x5d8] ss:$24 sps:$4 sm:$0xff]  }
 0x3e5   :  { %v2343_v18 = vrot.slane %v2342_v30, 1  ;;  %v2357_v63 = vrot.slane %v2356_v36, 1  ;;  %v2349_v40 = vadd.f32 %v2348_v38, %v2347_v29  ;;  %v2363_v23 = vadd.f32 %v2362_v13, %v2361_v37 }
 0x3e7   :  { %v2344_v42 = vadd.f32 %v2343_v18, %v2342_v30  ;;  %v2358_v3 = vadd.f32 %v2357_v63, %v2356_v36  ;;  %v2350_v45 = vrot.slane %v2349_v40, 1  ;;  %v2364_v48 = vrot.slane %v2363_v23, 1  ;;  %v4768_v18 = vld [vmem:[#allocation7 + $0x158] ss:$24 sps:$4 sm:$0xff]  }
 0x3e8   :  { %v4771_v63 = vld [vmem:[#allocation7 + $0x458] ss:$24 sps:$4 sm:$0xff]  }
 0x3e9   :  { %v2366_v46 = vmul.f32 0.5, %v2344_v42  ;;  %v2368_v47 = vmul.f32 0.5, %v2358_v3  ;;  %v2351_v49 = vadd.f32 %v2350_v45, %v2349_v40  ;;  %v2365_v52 = vadd.f32 %v2364_v48, %v2363_v23  ;;  %v4776_v40 = vld [vmem:[#allocation7 + $0x12c] ss:$24 sps:$4 sm:$0xff]   ;;  %v4774_v3 = vld [vmem:[#allocation7 + $0x128] ss:$24 sps:$4 sm:$0xff]  }
 0x3ea   :  { %v4779_v42 = vld [vmem:[#allocation7 + $0x42c] ss:$24 sps:$4 sm:$0xff]   ;;  %v4777_v23 = vld [vmem:[#allocation7 + $0x428] ss:$24 sps:$4 sm:$0xff]   ;;  %v4782_v45 = vld [vmem:[#allocation7 + $0xfc] ss:$24 sps:$4 sm:$0xff]  }
 0x3eb   :  { %v2410_v50 = vadd.f32 1e-05, %v2366_v46  ;;  %v2412_v51 = vadd.f32 1e-05, %v2368_v47  ;;  %v2367_v53 = vmul.f32 0.5, %v2351_v49  ;;  %v2369_v35 = vmul.f32 0.5, %v2365_v52 }
 0x3ec   :  { %v4785_v46 = vld [vmem:[#allocation7 + $0x3fc] ss:$24 sps:$4 sm:$0xff]   ;;  %v4780_v47 = vld [vmem:[#allocation7 + $0xf8] ss:$24 sps:$4 sm:$0xff]   ;;  %v4788_v49 = vld [vmem:[#allocation7 + $0xcc] ss:$24 sps:$4 sm:$0xff]  }
 0x3ed   :  { %4974 = vrsqrt.f32 %v2410_v50  ;;  %v2411_v32 = vadd.f32 1e-05, %v2367_v53  ;;  %v2413_v55 = vadd.f32 1e-05, %v2369_v35  ;;  %v4783_v48 = vld [vmem:[#allocation7 + $0x3f8] ss:$24 sps:$4 sm:$0xff]  }
 0x3ee   :  { %4976 = vrsqrt.f32 %v2412_v51  ;;  %v4791_v50 = vld [vmem:[#allocation7 + $0x3cc] ss:$24 sps:$4 sm:$0xff]   ;;  %v4786_v51 = vld [vmem:[#allocation7 + $0xc8] ss:$24 sps:$4 sm:$0xff]   ;;  %v4794_v53 = vld [vmem:[#allocation7 + $0x9c] ss:$24 sps:$4 sm:$0xff]  }
 0x3ef   :  { %4978 = vrsqrt.f32 %v2411_v32  ;;  %v4789_v52 = vld [vmem:[#allocation7 + $0x3c8] ss:$24 sps:$4 sm:$0xff]   ;;  %v4797_v35 = vld [vmem:[#allocation7 + $0x39c] ss:$24 sps:$4 sm:$0xff]   ;;  %v4792_v32 = vld [vmem:[#allocation7 + $0x98] ss:$24 sps:$4 sm:$0xff]  }
 0x3f0   :  { %4980 = vrsqrt.f32 %v2413_v55  ;;  %v4795_v55 = vld [vmem:[#allocation7 + $0x398] ss:$24 sps:$4 sm:$0xff]  }
 0x3fa   :  { %v4975_v12 = vpop.eup %4974 }
 0x3fb   :  { %v4977_v15 = vpop.eup %4976  ;;  %v2418_v16 = vmul.f32 %v4975_v12, %v2406_v7  ;;  %v4821_v7 = vld [vmem:[#allocation7 + $0x5dc] ss:$24 sps:$4 sm:$0xff]   ;;  %v4824_v12 = vld [vmem:[#allocation7 + $0x2ac] ss:$24 sps:$4 sm:$0xff]  }
 0x3fc   :  { %v2420_v19 = vmul.f32 %v4977_v15, %v2408_v14  ;;  %v4979_v24 = vpop.eup %4978  ;;  %v4827_v14 = vld [vmem:[#allocation7 + $0x5ac] ss:$24 sps:$4 sm:$0xff]   ;;  %v4822_v15 = vld [vmem:[#allocation7 + $0x2a8] ss:$24 sps:$4 sm:$0xff]  }
 0x3fd   :  { %v4981_v41 = vpop.eup %4980  ;;  %v2419_v27 = vmul.f32 %v4979_v24, %v2407_v20  ;;  %v2458_v4 = vadd.f32 %v2445_v17, %v2418_v16  ;;  %v4825_v16 = vld [vmem:[#allocation7 + $0x5a8] ss:$24 sps:$4 sm:$0xff]   ;;  %v4830_v17 = vld [vmem:[#allocation7 + $0x27c] ss:$24 sps:$4 sm:$0xff]   ;;  %v4828_v20 = vld [vmem:[#allocation7 + $0x278] ss:$24 sps:$4 sm:$0xff]  }
 0x3fe   :  { %v2421_v29 = vmul.f32 %v4981_v41, %v2409_v2  ;;  %v2460_v36 = vadd.f32 %v2453_v22, %v2420_v19  ;;  %v4833_v19 = vld [vmem:[#allocation7 + $0x57c] ss:$24 sps:$4 sm:$0xff]   ;;  %v4836_v22 = vld [vmem:[#allocation7 + $0x24c] ss:$24 sps:$4 sm:$0xff]   ;;  %v4834_v2 = vld [vmem:[#allocation7 + $0x248] ss:$24 sps:$4 sm:$0xff]  }
 0x3ff   :  { %v2459_v30 = vadd.f32 %v2449_v21, %v2419_v27  ;;  %v5352_v13 = vpack.c.bf16 %v2458_v4, %v2458_v4  ;;  %v4831_v21 = vld [vmem:[#allocation7 + $0x578] ss:$24 sps:$4 sm:$0xff]   ;;  %v4839_v24 = vld [vmem:[#allocation7 + $0x54c] ss:$24 sps:$4 sm:$0xff]   ;;  %v4842_v41 = vld [vmem:[#allocation7 + $0x21c] ss:$24 sps:$4 sm:$0xff]  }
 0x400   :  { %v2461_v37 = vadd.f32 %v2457_v25, %v2421_v29  ;;  %v5355_v9 = vpack.c.bf16 %v2460_v36, %v2460_v36  ;;  %v4837_v25 = vld [vmem:[#allocation7 + $0x548] ss:$24 sps:$4 sm:$0xff]   ;;  %v4845_v27 = vld [vmem:[#allocation7 + $0x51c] ss:$24 sps:$4 sm:$0xff]   ;;  %v4840_v29 = vld [vmem:[#allocation7 + $0x218] ss:$24 sps:$4 sm:$0xff]  }
 0x401   :  { %v5348_v38 = vpack.c.bf16 %v2459_v30, %v2459_v30  ;;  %v4843_v4 = vld [vmem:[#allocation7 + $0x518] ss:$24 sps:$4 sm:$0xff]   ;;  %v4848_v30 = vld [vmem:[#allocation7 + $0x1ec] ss:$24 sps:$4 sm:$0xff]  }
 0x402   :  { %v5350_v8 = vpack.c.bf16 %v2461_v37, %v2461_v37  ;;  %v4851_v36 = vld [vmem:[#allocation7 + $0x4ec] ss:$24 sps:$4 sm:$0xff]   ;;  %v4846_v37 = vld [vmem:[#allocation7 + $0x1e8] ss:$24 sps:$4 sm:$0xff]  }
 0x403   :  { %3682 = vmatprep.mubr.bf16.mxu0 %v5348_v38 }
 0x404   :  { %3723 = vmatprep.mubr.bf16.mxu1 %v5350_v8  ;;  %3683 = vmatmul.mubr.bf16.vlgmr.msra.gmra.mxu0 %v5352_v13 }
 0x405   :  { %3724 = vmatmul.mubr.bf16.vlgmr.msra.gmra.mxu1 %v5355_v9  ;;  %3733 = vmatpush1.bf16.msra.mxu0 %v4768_v18  ;;  %v4849_v18 = vld [vmem:[#allocation7 + $0x4e8] ss:$24 sps:$4 sm:$0xff]  }
 0x406   :  { %3774 = vmatpush1.bf16.msra.mxu1 %v4771_v63  ;;  %3764 = vmatprep.mubr.bf16.mxu0 %v5348_v38  ;;  %v4854_v63 = vld [vmem:[#allocation7 + $0x1bc] ss:$24 sps:$4 sm:$0xff]  }
 0x407   :  { %3805 = vmatprep.mubr.bf16.mxu1 %v5350_v8  ;;  %3734 = vmatprep.subr.bf16.mxu0 %v4776_v40  ;;  %v4857_v40 = vld [vmem:[#allocation7 + $0x4bc] ss:$24 sps:$4 sm:$0xff]  }
 0x408   :  { %3775 = vmatprep.subr.bf16.mxu1 %v4779_v42  ;;  %v4852_v42 = vld [vmem:[#allocation7 + $0x1b8] ss:$24 sps:$4 sm:$0xff]  }
 0x409   :  { %3735 = vmatpush1.bf16.msra.mxu0 %v4774_v3  ;;  %v4855_v3 = vld [vmem:[#allocation7 + $0x4b8] ss:$24 sps:$4 sm:$0xff]  }
 0x40a   :  { %3776 = vmatpush1.bf16.msra.mxu1 %v4777_v23  ;;  %3736 = vmatprep.subr.bf16.mxu0 %v4782_v45  ;;  %v4860_v23 = vld [vmem:[#allocation7 + $0x18c] ss:$24 sps:$4 sm:$0xff]  }
 0x40b   :  { %3777 = vmatprep.subr.bf16.mxu1 %v4785_v46  ;;  %v4863_v45 = vld [vmem:[#allocation7 + $0x48c] ss:$24 sps:$4 sm:$0xff]   ;;  %v4858_v46 = vld [vmem:[#allocation7 + $0x188] ss:$24 sps:$4 sm:$0xff]  }
 0x40d   :  { %3737 = vmatpush1.bf16.msra.mxu0 %v4780_v47  ;;  %v4861_v47 = vld [vmem:[#allocation7 + $0x488] ss:$24 sps:$4 sm:$0xff]  }
 0x40e   :  { %3778 = vmatpush1.bf16.msra.mxu1 %v4783_v48  ;;  %3738 = vmatprep.subr.bf16.mxu0 %v4788_v49  ;;  %v4866_v48 = vld [vmem:[#allocation7 + $0x164] ss:$24 sps:$4 sm:$0xff]  }
 0x40f   :  { %3779 = vmatprep.subr.bf16.mxu1 %v4791_v50  ;;  %v4869_v49 = vld [vmem:[#allocation7 + $0x464] ss:$24 sps:$4 sm:$0xff]   ;;  %v4864_v50 = vld [vmem:[#allocation7 + $0x160] ss:$24 sps:$4 sm:$0xff]  }
 0x411   :  { %3739 = vmatpush1.bf16.msra.mxu0 %v4786_v51  ;;  %v4867_v51 = vld [vmem:[#allocation7 + $0x460] ss:$24 sps:$4 sm:$0xff]  }
 0x412   :  { %3780 = vmatpush1.bf16.msra.mxu1 %v4789_v52  ;;  %3740 = vmatprep.subr.bf16.mxu0 %v4794_v53  ;;  %v4872_v52 = vld [vmem:[#allocation7 + $0x134] ss:$24 sps:$4 sm:$0xff]  }
 0x413   :  { %3781 = vmatprep.subr.bf16.mxu1 %v4797_v35  ;;  %v4875_v53 = vld [vmem:[#allocation7 + $0x434] ss:$24 sps:$4 sm:$0xff]   ;;  %v4870_v35 = vld [vmem:[#allocation7 + $0x130] ss:$24 sps:$4 sm:$0xff]  }
 0x415   :  { %3741 = vmatpush1.bf16.msra.mxu0 %v4792_v32  ;;  %v4873_v32 = vld [vmem:[#allocation7 + $0x430] ss:$24 sps:$4 sm:$0xff]  }
 0x416   :  { %3782 = vmatpush1.bf16.msra.mxu1 %v4795_v55  ;;  %3742 = vmatprep.subr.bf16.mxu0 %v4800_v56  ;;  %v4878_v55 = vld [vmem:[#allocation7 + $0x104] ss:$24 sps:$4 sm:$0xff]  }
 0x417   :  { %3783 = vmatprep.subr.bf16.mxu1 %v4803_v57  ;;  %v4881_v56 = vld [vmem:[#allocation7 + $0x404] ss:$24 sps:$4 sm:$0xff]   ;;  %v4876_v57 = vld [vmem:[#allocation7 + $0x100] ss:$24 sps:$4 sm:$0xff]  }
 0x419   :  { %3743 = vmatpush1.bf16.msra.mxu0 %v4798_v58  ;;  %v4879_v58 = vld [vmem:[#allocation7 + $0x400] ss:$24 sps:$4 sm:$0xff]  }
 0x41a   :  { %3784 = vmatpush1.bf16.msra.mxu1 %v4801_v59  ;;  %3744 = vmatprep.subr.bf16.mxu0 %v4806_v60  ;;  %v4884_v59 = vld [vmem:[#allocation7 + $0xd4] ss:$24 sps:$4 sm:$0xff]  }
 0x41b   :  { %3785 = vmatprep.subr.bf16.mxu1 %v4809_v61  ;;  %v4887_v60 = vld [vmem:[#allocation7 + $0x3d4] ss:$24 sps:$4 sm:$0xff]   ;;  %v4882_v61 = vld [vmem:[#allocation7 + $0xd0] ss:$24 sps:$4 sm:$0xff]  }
 0x41d   :  { %3745 = vmatpush1.bf16.msra.mxu0 %v4804_v62  ;;  %v4890_v62 = vld [vmem:[#allocation7 + $0xa4] ss:$24 sps:$4 sm:$0xff]  }
 0x41e   :  { %3786 = vmatpush1.bf16.msra.mxu1 %v4807_v0  ;;  %3746 = vmatprep.subr.bf16.mxu0 %v4812_v39  ;;  %v4893_v0 = vld [vmem:[#allocation7 + $0x3a4] ss:$24 sps:$4 sm:$0xff]   ;;  %v4891_v39 = vld [vmem:[#allocation7 + $0x3a0] ss:$24 sps:$4 sm:$0xff]  }
 0x41f   :  { %3787 = vmatprep.subr.bf16.mxu1 %v4815_v1  ;;  %v4896_v1 = vld [vmem:[#allocation7 + $0x74] ss:$24 sps:$4 sm:$0xff]  }
 0x421   :  { %3747 = vmatpush1.bf16.msra.mxu0 %v4810_v5  ;;  %v4899_v5 = vld [vmem:[#allocation7 + $0x374] ss:$24 sps:$4 sm:$0xff]  }
 0x422   :  { %3788 = vmatpush1.bf16.msra.mxu1 %v4813_v44  ;;  %3748 = vmatprep.subr.bf16.mxu0 %v4818_v6  ;;  %v4894_v44 = vld [vmem:[#allocation7 + $0x70] ss:$24 sps:$4 sm:$0xff]  }
 0x423   :  { %3789 = vmatprep.subr.bf16.mxu1 %v4821_v7  ;;  %v4897_v6 = vld [vmem:[#allocation7 + $0x370] ss:$24 sps:$4 sm:$0xff]   ;;  %v4902_v7 = vld [vmem:[#allocation7 + $0x44] ss:$24 sps:$4 sm:$0xff]  }
 0x425   :  { %3749 = vmatpush2.bf16.msra.mxu0 %v4816_v10  ;;  %v4905_v10 = vld [vmem:[#allocation7 + $0x344] ss:$24 sps:$4 sm:$0xff]  }
 0x426   :  { %3790 = vmatpush2.bf16.msra.mxu1 %v4819_v11  ;;  %3750 = vmatprep.subr.bf16.mxu0 %v4824_v12  ;;  %v4900_v11 = vld [vmem:[#allocation7 + $0x40] ss:$24 sps:$4 sm:$0xff]  }
 0x427   :  { %3791 = vmatprep.subr.bf16.mxu1 %v4827_v14  ;;  %v4903_v12 = vld [vmem:[#allocation7 + $0x340] ss:$24 sps:$4 sm:$0xff]   ;;  %v4908_v14 = vld [vmem:[#allocation7 + $0x14] ss:$24 sps:$4 sm:$0xff]  }
 0x429   :  { %3751 = vmatpush2.bf16.msra.mxu0 %v4822_v15  ;;  %v4911_v15 = vld [vmem:[#allocation7 + $0x314] ss:$24 sps:$4 sm:$0xff]  }
 0x42a   :  { %3792 = vmatpush2.bf16.msra.mxu1 %v4825_v16  ;;  %3752 = vmatprep.subr.bf16.mxu0 %v4830_v17  ;;  %v4906_v16 = vld [vmem:[#allocation7 + $0x10] ss:$24 sps:$4 sm:$0xff]  }
 0x42b   :  { %3793 = vmatprep.subr.bf16.mxu1 %v4833_v19  ;;  %v4909_v17 = vld [vmem:[#allocation7 + $0x310] ss:$24 sps:$4 sm:$0xff]   ;;  %v4914_v19 = vld [vmem:[#allocation7 + $0x2e4] ss:$24 sps:$4 sm:$0xff]  }
 0x42d   :  { %3753 = vmatpush2.bf16.msra.mxu0 %v4828_v20  ;;  %v4917_v20 = vld [vmem:[#allocation7 + $0x5e4] ss:$24 sps:$4 sm:$0xff]  }
 0x42e   :  { %3794 = vmatpush2.bf16.msra.mxu1 %v4831_v21  ;;  %3754 = vmatprep.subr.bf16.mxu0 %v4836_v22  ;;  %v4912_v21 = vld [vmem:[#allocation7 + $0x2e0] ss:$24 sps:$4 sm:$0xff]  }
 0x42f   :  { %3795 = vmatprep.subr.bf16.mxu1 %v4839_v24  ;;  %v4915_v22 = vld [vmem:[#allocation7 + $0x5e0] ss:$24 sps:$4 sm:$0xff]   ;;  %v4920_v24 = vld [vmem:[#allocation7 + $0x2b4] ss:$24 sps:$4 sm:$0xff]  }
 0x431   :  { %3755 = vmatpush2.bf16.msra.mxu0 %v4834_v2  ;;  %v4923_v2 = vld [vmem:[#allocation7 + $0x5b4] ss:$24 sps:$4 sm:$0xff]  }
 0x432   :  { %3796 = vmatpush2.bf16.msra.mxu1 %v4837_v25  ;;  %3756 = vmatprep.subr.bf16.mxu0 %v4842_v41  ;;  %v4918_v25 = vld [vmem:[#allocation7 + $0x2b0] ss:$24 sps:$4 sm:$0xff]  }
 0x433   :  { %3797 = vmatprep.subr.bf16.mxu1 %v4845_v27  ;;  %v4921_v41 = vld [vmem:[#allocation7 + $0x5b0] ss:$24 sps:$4 sm:$0xff]   ;;  %v4926_v27 = vld [vmem:[#allocation7 + $0x284] ss:$24 sps:$4 sm:$0xff]  }
 0x435   :  { %3757 = vmatpush2.bf16.msra.mxu0 %v4840_v29  ;;  %v4929_v29 = vld [vmem:[#allocation7 + $0x584] ss:$24 sps:$4 sm:$0xff]  }
 0x436   :  { %3798 = vmatpush2.bf16.msra.mxu1 %v4843_v4  ;;  %3758 = vmatprep.subr.bf16.mxu0 %v4848_v30  ;;  %v4924_v4 = vld [vmem:[#allocation7 + $0x280] ss:$24 sps:$4 sm:$0xff]  }
 0x437   :  { %3799 = vmatprep.subr.bf16.mxu1 %v4851_v36  ;;  %v4927_v30 = vld [vmem:[#allocation7 + $0x580] ss:$24 sps:$4 sm:$0xff]   ;;  %v4932_v36 = vld [vmem:[#allocation7 + $0x254] ss:$24 sps:$4 sm:$0xff]  }
 0x439   :  { %3759 = vmatpush2.bf16.msra.mxu0 %v4846_v37  ;;  %v4935_v37 = vld [vmem:[#allocation7 + $0x554] ss:$24 sps:$4 sm:$0xff]  }
 0x43a   :  { %3800 = vmatpush2.bf16.msra.mxu1 %v4849_v18  ;;  %3760 = vmatprep.subr.bf16.mxu0 %v4854_v63  ;;  %v4930_v18 = vld [vmem:[#allocation7 + $0x250] ss:$24 sps:$4 sm:$0xff]  }
 0x43b   :  { %3801 = vmatprep.subr.bf16.mxu1 %v4857_v40  ;;  %v4933_v63 = vld [vmem:[#allocation7 + $0x550] ss:$24 sps:$4 sm:$0xff]   ;;  %v4938_v40 = vld [vmem:[#allocation7 + $0x224] ss:$24 sps:$4 sm:$0xff]  }
 0x43d   :  { %3761 = vmatpush2.bf16.msra.mxu0 %v4852_v42  ;;  %v4941_v42 = vld [vmem:[#allocation7 + $0x524] ss:$24 sps:$4 sm:$0xff]  }
 0x43e   :  { %3802 = vmatpush2.bf16.msra.mxu1 %v4855_v3  ;;  %3762 = vmatprep.subr.bf16.mxu0 %v4860_v23  ;;  %v4936_v3 = vld [vmem:[#allocation7 + $0x220] ss:$24 sps:$4 sm:$0xff]  }
 0x43f   :  { %3803 = vmatprep.subr.bf16.mxu1 %v4863_v45  ;;  %v4939_v23 = vld [vmem:[#allocation7 + $0x520] ss:$24 sps:$4 sm:$0xff]   ;;  %v4944_v45 = vld [vmem:[#allocation7 + $0x1f4] ss:$24 sps:$4 sm:$0xff]  }
 0x441   :  { %3763 = vmatpush2.bf16.msra.mxu0 %v4858_v46  ;;  %v4947_v46 = vld [vmem:[#allocation7 + $0x4f4] ss:$24 sps:$4 sm:$0xff]  }
 0x442   :  { %3804 = vmatpush2.bf16.msra.mxu1 %v4861_v47  ;;  %3814 = vmatprep.subr.bf16.mxu0 %v4866_v48  ;;  %v4942_v47 = vld [vmem:[#allocation7 + $0x1f0] ss:$24 sps:$4 sm:$0xff]  }
 0x443   :  { %3855 = vmatprep.subr.bf16.mxu1 %v4869_v49  ;;  %v4945_v48 = vld [vmem:[#allocation7 + $0x4f0] ss:$24 sps:$4 sm:$0xff]   ;;  %v4950_v49 = vld [vmem:[#allocation7 + $0x1c4] ss:$24 sps:$4 sm:$0xff]  }
 0x444   :  { %3765 = vmatmul.mubr.bf16.vlgmr.msra.gmra.mxu0 %v5352_v13 }
 0x445   :  { %3806 = vmatmul.mubr.bf16.vlgmr.msra.gmra.mxu1 %v5355_v9  ;;  %3815 = vmatpush1.bf16.msra.mxu0 %v4864_v50  ;;  %v4953_v50 = vld [vmem:[#allocation7 + $0x4c4] ss:$24 sps:$4 sm:$0xff]  }
 0x446   :  { %3846 = vmatprep.mubr.bf16.mxu0 %v5348_v38  ;;  %3856 = vmatpush1.bf16.msra.mxu1 %v4867_v51  ;;  %v4885_v38 = vld [vmem:[#allocation7 + $0x3d0] ss:$24 sps:$4 sm:$0xff]   ;;  %v4948_v51 = vld [vmem:[#allocation7 + $0x1c0] ss:$24 sps:$4 sm:$0xff]  }
 0x447   :  { %3887 = vmatprep.mubr.bf16.mxu1 %v5350_v8  ;;  %3816 = vmatprep.subr.bf16.mxu0 %v4872_v52  ;;  %v4888_v8 = vld [vmem:[#allocation7 + $0xa0] ss:$24 sps:$4 sm:$0xff]  }
 0x448   :  { %3857 = vmatprep.subr.bf16.mxu1 %v4875_v53  ;;  %v4951_v52 = vld [vmem:[#allocation7 + $0x4c0] ss:$24 sps:$4 sm:$0xff]   ;;  %v4956_v53 = vld [vmem:[#allocation7 + $0x194] ss:$24 sps:$4 sm:$0xff]  }
 0x449   :  { %3817 = vmatpush1.bf16.msra.mxu0 %v4870_v35  ;;  %v4959_v35 = vld [vmem:[#allocation7 + $0x494] ss:$24 sps:$4 sm:$0xff]  }
 0x44a   :  { %3858 = vmatpush1.bf16.msra.mxu1 %v4873_v32  ;;  %3818 = vmatprep.subr.bf16.mxu0 %v4878_v55  ;;  %v4954_v32 = vld [vmem:[#allocation7 + $0x190] ss:$24 sps:$4 sm:$0xff]  }
 0x44b   :  { %3859 = vmatprep.subr.bf16.mxu1 %v4881_v56  ;;  %v4957_v55 = vld [vmem:[#allocation7 + $0x490] ss:$24 sps:$4 sm:$0xff]   ;;  %v5371_v56 = vld [vmem:[%s5400_s8] sm:$0x3f] }
 0x44d   :  { %3819 = vmatpush1.bf16.msra.mxu0 %v4876_v57  ;;  %v2663_v57 = vrot.slane %v5371_v56, %v5227_v26 }
 0x44e   :  { %3860 = vmatpush1.bf16.msra.mxu1 %v4879_v58  ;;  %3820 = vmatprep.subr.bf16.mxu0 %v4884_v59  ;;  %v2667_v58 = vrot.slane %v5371_v56, %v5241_v33 }
 0x44f   :  { %3861 = vmatprep.subr.bf16.mxu1 %v4887_v60 }
 0x451   :  { %3821 = vmatpush1.bf16.msra.mxu0 %v4882_v61 }
 0x452   :  { %3862 = vmatpush1.bf16.msra.mxu1 %v4885_v38  ;;  %3822 = vmatprep.subr.bf16.mxu0 %v4890_v62 }
 0x453   :  { %3863 = vmatprep.subr.bf16.mxu1 %v4893_v0 }
 0x455   :  { %3823 = vmatpush1.bf16.msra.mxu0 %v4888_v8 }
 0x456   :  { %3864 = vmatpush1.bf16.msra.mxu1 %v4891_v39  ;;  %3824 = vmatprep.subr.bf16.mxu0 %v4896_v1 }
 0x457   :  { %3865 = vmatprep.subr.bf16.mxu1 %v4899_v5 }
 0x459   :  { %3825 = vmatpush1.bf16.msra.mxu0 %v4894_v44 }
 0x45a   :  { %3866 = vmatpush1.bf16.msra.mxu1 %v4897_v6  ;;  %3826 = vmatprep.subr.bf16.mxu0 %v4902_v7 }
 0x45b   :  { %3867 = vmatprep.subr.bf16.mxu1 %v4905_v10 }
 0x45d   :  { %3827 = vmatpush1.bf16.msra.mxu0 %v4900_v11 }
 0x45e   :  { %3868 = vmatpush1.bf16.msra.mxu1 %v4903_v12  ;;  %3828 = vmatprep.subr.bf16.mxu0 %v4908_v14 }
 0x45f   :  { %3869 = vmatprep.subr.bf16.mxu1 %v4911_v15  ;;  %v2671_v15 = vrot.slane %v5371_v56, %v5280_v34 }
 0x461   :  { %3829 = vmatpush1.bf16.msra.mxu0 %v4906_v16  ;;  %v2675_v16 = vrot.slane %v5371_v56, %v5285_v54 }
 0x462   :  { %3870 = vmatpush1.bf16.msra.mxu1 %v4909_v17  ;;  %3830 = vmatprep.subr.bf16.mxu0 %v4914_v19 }
 0x463   :  { %3871 = vmatprep.subr.bf16.mxu1 %v4917_v20 }
 0x465   :  { %3831 = vmatpush2.bf16.msra.mxu0 %v4912_v21 }
 0x466   :  { %3872 = vmatpush2.bf16.msra.mxu1 %v4915_v22  ;;  %3832 = vmatprep.subr.bf16.mxu0 %v4920_v24 }
 0x467   :  { %3873 = vmatprep.subr.bf16.mxu1 %v4923_v2 }
 0x469   :  { %3833 = vmatpush2.bf16.msra.mxu0 %v4918_v25 }
 0x46a   :  { %3874 = vmatpush2.bf16.msra.mxu1 %v4921_v41  ;;  %3834 = vmatprep.subr.bf16.mxu0 %v4926_v27 }
 0x46b   :  { %3875 = vmatprep.subr.bf16.mxu1 %v4929_v29 }
 0x46d   :  { %3835 = vmatpush2.bf16.msra.mxu0 %v4924_v4 }
 0x46e   :  { %3876 = vmatpush2.bf16.msra.mxu1 %v4927_v30  ;;  %3836 = vmatprep.subr.bf16.mxu0 %v4932_v36 }
 0x46f   :  { %3877 = vmatprep.subr.bf16.mxu1 %v4935_v37 }
 0x471   :  { %3837 = vmatpush2.bf16.msra.mxu0 %v4930_v18 }
 0x472   :  { %3878 = vmatpush2.bf16.msra.mxu1 %v4933_v63  ;;  %3838 = vmatprep.subr.bf16.mxu0 %v4938_v40  ;;  %v5105_v63 = vmov 1983009808  }
 0x473   :  { %3879 = vmatprep.subr.bf16.mxu1 %v4941_v42  ;;  %v3941_v40 = vunpack.c.l.s4 %v5105_v63 }
 0x475   :  { %3839 = vmatpush2.bf16.msra.mxu0 %v4936_v3  ;;  %v3942_v42 = vunpack.c.0.s8 %v3941_v40 }
 0x476   :  { %3880 = vmatpush2.bf16.msra.mxu1 %v4939_v23  ;;  %3840 = vmatprep.subr.bf16.mxu0 %v4944_v45 }
 0x477   :  { %3881 = vmatprep.subr.bf16.mxu1 %v4947_v46  ;;  %v3945_v23 = vsub.s32 %v3942_v42, %v5173_v43 }
 0x479   :  { %3841 = vmatpush2.bf16.msra.mxu0 %v4942_v47 }
 0x47a   :  { %3882 = vmatpush2.bf16.msra.mxu1 %v4945_v48  ;;  %3842 = vmatprep.subr.bf16.mxu0 %v4950_v49 }
 0x47b   :  { %3883 = vmatprep.subr.bf16.mxu1 %v4953_v50  ;;  %v2679_v50 = vrot.slane %v5371_v56, %v5233_v28 }
 0x47d   :  { %3843 = vmatpush2.bf16.msra.mxu0 %v4948_v51  ;;  %v2683_v51 = vrot.slane %v5371_v56, %v5238_v31 }
 0x47e   :  { %3884 = vmatpush2.bf16.msra.mxu1 %v4951_v52  ;;  %3844 = vmatprep.subr.bf16.mxu0 %v4956_v53 }
 0x47f   :  { %3885 = vmatprep.subr.bf16.mxu1 %v4959_v35 }
 0x481   :  { %3845 = vmatpush2.bf16.msra.mxu0 %v4954_v32 }
 0x482   :  { %3886 = vmatpush2.bf16.msra.mxu1 %v4957_v55 }
 0x484   :  { %3847 = vmatmul.mubr.bf16.vlgmr.msra.gmra.mxu0 %v5352_v13 }
 0x485   :  { %3888 = vmatmul.mubr.bf16.vlgmr.msra.gmra.mxu1 %v5355_v9 }
 0x4c4   :  { %v3684_v59 = vpop.f32.mrf.mxu0 }
 0x4c5   :  { %v3685_v60 = vadd.f32 %v3684_v59, %v2663_v57  ;;  %v3725_v61 = vpop.f32.mrf.mxu1 }
 0x4c6   :  { %v3686_v38 = vpop.f32.mrf.mxu0 }
 0x4c7   :  { %v3726_v62 = vadd.f32 %v3725_v61, %v3685_v60  ;;  %v3687_v0 = vadd.f32 %v3686_v38, %v2667_v58  ;;  %v3727_v13 = vpop.f32.mrf.mxu1 }
 0x4c8   :  { %v3688_v8 = vpop.f32.mrf.mxu0 }
 0x4c9   :  { %v4363_v9 = vmul.f32 -1.442695, %v3726_v62  ;;  %v3728_v39 = vadd.f32 %v3727_v13, %v3687_v0  ;;  %v3729_v1 = vpop.f32.mrf.mxu1 }
 0x4ca   :  { %v3689_v5 = vpop.f32.mrf.mxu0 }
 0x4cb   :  { %4982 = vpow2.f32 %v4363_v9  ;;  %v4364_v44 = vmul.f32 -1.442695, %v3728_v39  ;;  %v3730_v6 = vpop.f32.mrf.mxu1 }
 0x4cd   :  { %4984 = vpow2.f32 %v4364_v44 }
 0x4d8   :  { %v4983_v26 = vpop.eup %4982 }
 0x4d9   :  { %v3914_v7 = vadd.f32 1.0, %v4983_v26 }
 0x4da   :  { %v4985_v10 = vpop.eup %4984 }
 0x4db   :  { %v3915_v33 = vadd.f32 1.0, %v4985_v10  ;;  %4986 = vrcp.f32 %v3914_v7 }
 0x4dd   :  { %4988 = vrcp.f32 %v3915_v33 }
 0x4e8   :  { %v4987_v11 = vpop.eup %4986 }
 0x4ea   :  { %v4989_v12 = vpop.eup %4988 }
 0x4eb   :  { %v3938_v14 = vcombine.low %v4987_v11, %v4989_v12 }
 0x4ed   :  { %v3946_v47 = vrot.slane %v3938_v14, %v3945_v23 }
 0x504   :  { %v3766_v17 = vpop.f32.mrf.mxu0 }
 0x505   :  { %v3767_v19 = vadd.f32 %v3766_v17, %v2671_v15  ;;  %v3807_v20 = vpop.f32.mrf.mxu1 }
 0x506   :  { %v3768_v21 = vpop.f32.mrf.mxu0 }
 0x507   :  { %v3808_v22 = vadd.f32 %v3807_v20, %v3767_v19  ;;  %v3769_v24 = vadd.f32 %v3768_v21, %v2675_v16  ;;  %v3809_v2 = vpop.f32.mrf.mxu1 }
 0x508   :  { %v3770_v25 = vpop.f32.mrf.mxu0 }
 0x509   :  { %v4365_v41 = vmul.f32 -1.442695, %v3808_v22  ;;  %v3810_v27 = vadd.f32 %v3809_v2, %v3769_v24  ;;  %v3811_v29 = vpop.f32.mrf.mxu1 }
 0x50a   :  { %v3771_v4 = vpop.f32.mrf.mxu0 }
 0x50b   :  { %4990 = vpow2.f32 %v4365_v41  ;;  %v4366_v30 = vmul.f32 -1.442695, %v3810_v27  ;;  %v3812_v36 = vpop.f32.mrf.mxu1 }
 0x50d   :  { %4992 = vpow2.f32 %v4366_v30 }
 0x518   :  { %v4991_v34 = vpop.eup %4990 }
 0x519   :  { %v3916_v37 = vadd.f32 1.0, %v4991_v34 }
 0x51a   :  { %v4993_v18 = vpop.eup %4992 }
 0x51b   :  { %v3917_v54 = vadd.f32 1.0, %v4993_v18  ;;  %4994 = vrcp.f32 %v3916_v37 }
 0x51d   :  { %4996 = vrcp.f32 %v3917_v54 }
 0x528   :  { %v4995_v3 = vpop.eup %4994 }
 0x52a   :  { %v4997_v45 = vpop.eup %4996 }
 0x52b   :  { %v3939_v46 = vcombine.low %v4995_v3, %v4997_v45 }
 0x52d   :  { %v3953_v48 = vrot.slane %v3939_v46, %v3945_v23 }
 0x52f   :  { %v3954_v49 = vcombine.low %v3946_v47, %v3953_v48 }
 0x531   :  { %3965 = vst [vmem:[%s5402_s10] sm:$0xff] %v3954_v49 }
 0x544   :  { %v3848_v52 = vpop.f32.mrf.mxu0 }
 0x545   :  { %v3849_v53 = vadd.f32 %v3848_v52, %v2679_v50  ;;  %v3889_v35 = vpop.f32.mrf.mxu1 }
 0x546   :  { %v3850_v32 = vpop.f32.mrf.mxu0 }
 0x547   :  { %v3890_v43 = vadd.f32 %v3889_v35, %v3849_v53  ;;  %v3851_v55 = vadd.f32 %v3850_v32, %v2683_v51  ;;  %v3891_v57 = vpop.f32.mrf.mxu1 }
 0x548   :  { %v3852_v58 = vpop.f32.mrf.mxu0 }
 0x549   :  { %v4367_v59 = vmul.f32 -1.442695, %v3890_v43  ;;  %v3892_v60 = vadd.f32 %v3891_v57, %v3851_v55  ;;  %v3893_v61 = vpop.f32.mrf.mxu1 }
 0x54a   :  { %v3853_v38 = vpop.f32.mrf.mxu0 }
 0x54b   :  { %4998 = vpow2.f32 %v4367_v59  ;;  %v4368_v62 = vmul.f32 -1.442695, %v3892_v60  ;;  %v3894_v0 = vpop.f32.mrf.mxu1 }
 0x54d   :  { %5000 = vpow2.f32 %v4368_v62 }
 0x558   :  { %v4999_v28 = vpop.eup %4998 }
 0x559   :  { %v3918_v13 = vadd.f32 1.0, %v4999_v28 }
 0x55a   :  { %v5001_v8 = vpop.eup %5000 }
 0x55b   :  { %v3919_v31 = vadd.f32 1.0, %v5001_v8  ;;  %5002 = vrcp.f32 %v3918_v13 }
 0x55d   :  { %5004 = vrcp.f32 %v3919_v31 }
 0x568   :  { %v5003_v56 = vpop.eup %5002 }
 0x56a   :  { %v5005_v9 = vpop.eup %5004 }
 0x56b   :  { %v3955_v39 = vcombine.low %v5003_v56, %v5005_v9 }
 0x56d   :  { %4369 = vst.sshfl [vmem:[%s5402_s10 + $0x8] sm:$0x33 pattern:$0x76325410] %v3955_v39 }
 0x56e   :  { %3975 = vsyncpa [#allocation3], 1 }
 0x56f   :  { %3976 = vsyncpa [#allocation5], 1 }
 0x570   :  { %3977 = vsyncpa [#allocation8], 1 }

</bundles_post_ra>
